<compile_context>
chip_gen: v7x
topology: tpu7x:2x2x1
jax: 0.10.0
libtpu: 0.0.40
codegen_flags: <defaults>
</compile_context>

<pallas_src>
import jax
import jax.numpy as jnp
from jax.experimental import pallas as pl
from jax.experimental.pallas import tpu as pltpu

# ---------------- hyperparameters (small, consistent with the module) -------
VOCAB_SIZE = 65
VOCAB_PAD = 128          # lane-dense padding for embedding rows / lm_head cols
N_EMBED = 32
BLOCK_SIZE = 8           # max sequence length (position table size)
N_HEAD = 4
N_LAYER = 2
HEAD_SIZE = N_EMBED // N_HEAD
FF_HIDDEN = 4 * N_EMBED  # = 128
LN_EPS = 1e-5
NEG_INF = -1e30          # finite "masked" value (no exp(-inf) NaN risk)

_VECS_PER_LAYER = 7      # ln1_g, ln1_b, bo, ln2_g, ln2_b, b2, b1


def _layernorm(x, gamma, beta):
    mean = jnp.mean(x, axis=-1, keepdims=True)
    var = jnp.mean((x - mean) ** 2, axis=-1, keepdims=True)
    inv = jax.lax.rsqrt(var + LN_EPS)
    return (x - mean) * inv * gamma + beta


def _softmax_lastdim(s):
    m = jnp.max(s, axis=-1, keepdims=True)
    e = jnp.exp(s - m)
    return e * pl.reciprocal(jnp.sum(e, axis=-1, keepdims=True), approx=True)


# ---------------------------- fused per-sequence forward kernel -------------
def gpt_kernel(idx_ref, emb_ref, w_in_ref, w_out_ref, vec_ref, lm_w_ref, o_ref):
    T = idx_ref.shape[1]
    C, H, HS, FF = N_EMBED, N_HEAD, HEAD_SIZE, FF_HIDDEN
    n_layer = w_in_ref.shape[0]

    # --- token gather (one-hot on the MXU) + position embedding -------------
    idxv = idx_ref[0]                                                   # (T, 1) int32
    tok_oh = (jax.lax.broadcasted_iota(jnp.int32, (T, VOCAB_PAD), 1)
              == idxv).astype(jnp.bfloat16)                             # (T, Vpad)
    x = jnp.dot(tok_oh, emb_ref[0:VOCAB_PAD, :],
                preferred_element_type=jnp.float32)                     # (T, C) f32
    x = x + emb_ref[VOCAB_PAD:VOCAB_PAD + T, :].astype(jnp.float32)     # + pos

    # --- causal additive bias, generated in-kernel (per sequence) -----------
    rows = jax.lax.broadcasted_iota(jnp.int32, (T, T), 0)
    cols = jax.lax.broadcasted_iota(jnp.int32, (T, T), 1)
    bias = jnp.where(cols <= rows, 0.0, NEG_INF).astype(jnp.float32)    # (T, T)

    for l in range(n_layer):
        base = l * _VECS_PER_LAYER
        ln1g = vec_ref[base + 0:base + 1, 0:C]
        ln1b = vec_ref[base + 1:base + 2, 0:C]
        bo   = vec_ref[base + 2:base + 3, 0:C]
        ln2g = vec_ref[base + 3:base + 4, 0:C]
        ln2b = vec_ref[base + 4:base + 5, 0:C]
        b2   = vec_ref[base + 5:base + 6, 0:C]
        b1   = vec_ref[base + 6:base + 7, 0:FF]

        wqkv = w_in_ref[l, :, 0:3 * C]          # (C, 3C)  bf16, Q scaled
        wo   = w_in_ref[l, :, 3 * C:4 * C]      # (C, C)   bf16
        w1   = w_in_ref[l, :, 4 * C:4 * C + FF] # (C, FF)  bf16
        w2   = w_out_ref[l]                     # (FF, C)  bf16

        # --- multi-head causal self-attention (pre-LN) ----------------------
        h = _layernorm(x, ln1g, ln1b)                                   # (T, C) f32
        qkv = jnp.dot(h.astype(jnp.bfloat16), wqkv,
                      preferred_element_type=jnp.float32)               # (T, 3C) f32

        att = None
        for hd in range(H):
            qh = qkv[:, hd * HS:(hd + 1) * HS].astype(jnp.bfloat16)             # (T, hs)
            kh = qkv[:, C + hd * HS:C + (hd + 1) * HS].astype(jnp.bfloat16)     # (T, hs)
            vh = qkv[:, 2 * C + hd * HS:2 * C + (hd + 1) * HS].astype(jnp.bfloat16)
            s = jnp.einsum('qd,kd->qk', qh, kh,
                           preferred_element_type=jnp.float32)          # (T, T)
            p = _softmax_lastdim(s + bias)
            ohd = jnp.dot(p.astype(jnp.bfloat16), vh,
                          preferred_element_type=jnp.float32)           # (T, hs)
            # fused out-projection + head-sum (accumulates on the MXU)
            contrib = jnp.dot(ohd.astype(jnp.bfloat16),
                              wo[hd * HS:(hd + 1) * HS, :],
                              preferred_element_type=jnp.float32)       # (T, C)
            att = contrib if att is None else att + contrib
        x = x + att + bo

        # --- feed-forward (pre-LN) -------------------------------------------
        h2 = _layernorm(x, ln2g, ln2b)
        ff = jnp.dot(h2.astype(jnp.bfloat16), w1,
                     preferred_element_type=jnp.float32) + b1
        ff = jnp.maximum(ff, 0.0)
        x = x + jnp.dot(ff.astype(jnp.bfloat16), w2,
                        preferred_element_type=jnp.float32) + b2

    # --- final LN + lm_head (lane-padded vocab, unmasked stores) ------------
    fb = n_layer * _VECS_PER_LAYER
    lnfg = vec_ref[fb + 0:fb + 1, 0:C]
    lnfb = vec_ref[fb + 1:fb + 2, 0:C]
    lmb  = vec_ref[fb + 2:fb + 3, :]                                    # (1, Vpad)
    h = _layernorm(x, lnfg, lnfb)
    o_ref[0] = (jnp.dot(h.astype(jnp.bfloat16), lm_w_ref[...],
                        preferred_element_type=jnp.float32) + lmb
                ).astype(o_ref.dtype)


# ---------------------------- parameter init (deterministic) ----------------
def init_params(key):
    std = 0.02
    C, H, HS, FF = N_EMBED, N_HEAD, HEAD_SIZE, FF_HIDDEN
    V, VP, T = VOCAB_SIZE, VOCAB_PAD, BLOCK_SIZE
    ks = iter(jax.random.split(key, 4 + 6 * N_LAYER))

    def lin(shape):
        return (jax.random.normal(next(ks), shape) * std).astype(jnp.float32)

    def pad128(v):
        return jnp.zeros((1, 128), jnp.float32).at[0, :v.shape[-1]].set(
            v.reshape(-1))

    # token (padded to 128 rows) + positional embedding, one packed table
    tok = lin((V, C))
    pos = lin((T, C))
    emb = jnp.zeros((VP + T, C), jnp.float32).at[:V].set(tok).at[VP:].set(pos)

    scale = HS ** -0.5
    w_in_layers, w_out_layers, vec_rows = [], [], []
    for _ in range(N_LAYER):
        wq, wk, wv = lin((C, C)), lin((C, C)), lin((C, C))
        wo = lin((C, C))
        w1 = lin((C, FF))
        w2 = lin((FF, C))
        wqkv = jnp.concatenate([wq * scale, wk, wv], axis=1)            # (C, 3C)
        w_in_layers.append(jnp.concatenate([wqkv, wo, w1], axis=1))     # (C, 256)
        w_out_layers.append(w2)                                         # (FF, C)
        vec_rows += [
            pad128(jnp.ones((C,), jnp.float32)),    # ln1 gamma
            pad128(jnp.zeros((C,), jnp.float32)),   # ln1 beta
            pad128(jnp.zeros((C,), jnp.float32)),   # attn proj bias
            pad128(jnp.ones((C,), jnp.float32)),    # ln2 gamma
            pad128(jnp.zeros((C,), jnp.float32)),   # ln2 beta
            pad128(jnp.zeros((C,), jnp.float32)),   # ff second bias
            pad128(jnp.zeros((FF,), jnp.float32)),  # ff first bias
        ]
    vec_rows += [
        pad128(jnp.ones((C,), jnp.float32)),        # ln_f gamma
        pad128(jnp.zeros((C,), jnp.float32)),       # ln_f beta
        jnp.zeros((1, VP), jnp.float32),            # lm_head bias (padded)
    ]

    lm_w = jnp.zeros((C, VP), jnp.float32).at[:, :V].set(lin((C, V)))

    return {
        "emb":   emb.astype(jnp.bfloat16),                               # (136, C)
        "w_in":  jnp.stack(w_in_layers).astype(jnp.bfloat16),            # (L, C, 256)
        "w_out": jnp.stack(w_out_layers).astype(jnp.bfloat16),           # (L, FF, C)
        "vecs":  jnp.concatenate(vec_rows, axis=0),                      # (7L+3, 128) f32
        "lm_w":  lm_w.astype(jnp.bfloat16),                              # (C, Vpad)
    }


# ---------------------------- forward (targets=None path) -------------------
@jax.jit
def forward(params, idx):
    B, T = idx.shape
    assert T <= BLOCK_SIZE
    idx_in = idx.reshape(B, T, 1).astype(jnp.int32)

    out = pl.pallas_call(
        gpt_kernel,
        out_shape=jax.ShapeDtypeStruct((B, T, VOCAB_PAD), jnp.float32),
        grid_spec=pltpu.PrefetchScalarGridSpec(
            num_scalar_prefetch=0,
            grid=(B,),
            in_specs=[
                pl.BlockSpec((1, T, 1), lambda b: (b, 0, 0)),
                pl.BlockSpec(params["emb"].shape,   lambda b: (0, 0)),
                pl.BlockSpec(params["w_in"].shape,  lambda b: (0, 0, 0)),
                pl.BlockSpec(params["w_out"].shape, lambda b: (0, 0, 0)),
                pl.BlockSpec(params["vecs"].shape,  lambda b: (0, 0)),
                pl.BlockSpec(params["lm_w"].shape,  lambda b: (0, 0)),
            ],
            out_specs=pl.BlockSpec((1, T, VOCAB_PAD), lambda b: (b, 0, 0)),
        ),
        compiler_params=pltpu.CompilerParams(
            dimension_semantics=("parallel",)),
    )(idx_in, params["emb"], params["w_in"], params["w_out"],
      params["vecs"], params["lm_w"])

    logits = out[:, :, :VOCAB_SIZE]
    loss = None  # targets=None branch of the reference
    # TODO(synk): cross-entropy loss branch (targets provided) not implemented in-kernel.
    return logits, loss


if __name__ == "__main__":
    key = jax.random.PRNGKey(0)
    pkey, dkey = jax.random.split(key)
    params = init_params(pkey)

    B, T = 2, BLOCK_SIZE
    idx = jax.random.randint(dkey, (B, T), 0, VOCAB_SIZE, dtype=jnp.int32)

    logits, loss = forward(params, idx)
    logits = jax.block_until_ready(logits)
    assert logits.shape == (B, T, VOCAB_SIZE)
    assert loss is None
    assert bool(jnp.all(jnp.isfinite(logits)))
    print("KERNEL_OK")
</pallas_src>

<mosaic_0001>
module attributes {stable_mosaic.version = 11 : i64} {
  func.func @gpt_kernel(%arg0: i32, %arg1: memref<1x8x1xi32, #tpu.memory_space<vmem>>, %arg2: memref<136x32xbf16, #tpu.memory_space<vmem>>, %arg3: memref<2x32x256xbf16, #tpu.memory_space<vmem>>, %arg4: memref<2x128x32xbf16, #tpu.memory_space<vmem>>, %arg5: memref<17x128xf32, #tpu.memory_space<vmem>>, %arg6: memref<32x128xbf16, #tpu.memory_space<vmem>>, %arg7: memref<1x8x128xf32, #tpu.memory_space<vmem>>) attributes {dimension_semantics = [#tpu.dimension_semantics<parallel>], iteration_bounds = array<i64: 2>, scalar_prefetch = 0 : i64, scratch_operands = 0 : i64, tpu.core_type = #tpu.core_type<tc>, window_params = [{transform_indices = @transform_0, window_bounds = array<i64: 1, 8, 1>}, {pipeline_mode = #tpu.pipeline_mode<synchronous>, transform_indices = @transform_1, window_bounds = array<i64: 136, 32>}, {pipeline_mode = #tpu.pipeline_mode<synchronous>, transform_indices = @transform_2, window_bounds = array<i64: 2, 32, 256>}, {pipeline_mode = #tpu.pipeline_mode<synchronous>, transform_indices = @transform_3, window_bounds = array<i64: 2, 128, 32>}, {pipeline_mode = #tpu.pipeline_mode<synchronous>, transform_indices = @transform_4, window_bounds = array<i64: 17, 128>}, {pipeline_mode = #tpu.pipeline_mode<synchronous>, transform_indices = @transform_5, window_bounds = array<i64: 32, 128>}, {transform_indices = @transform_6, window_bounds = array<i64: 1, 8, 128>}]} {
    %c0 = arith.constant 0 : index
    %c0_0 = arith.constant 0 : index
    %c0_1 = arith.constant 0 : index
    %0 = vector.load %arg1[%c0, %c0_0, %c0_1] : memref<1x8x1xi32, #tpu.memory_space<vmem>>, vector<1x8x1xi32>
    %1 = vector.shape_cast %0 : vector<1x8x1xi32> to vector<8x1xi32>
    %2 = tpu.iota {dimensions = array<i32: 1>} : vector<8x128xi32>
    %3 = vector.broadcast %1 : vector<8x1xi32> to vector<8x128xi32>
    %4 = arith.cmpi eq, %2, %3 : vector<8x128xi32>
    %5 = arith.extui %4 : vector<8x128xi1> to vector<8x128xi32>
    %6 = arith.sitofp %5 : vector<8x128xi32> to vector<8x128xf32>
    %7 = arith.truncf %6 : vector<8x128xf32> to vector<8x128xbf16>
    %c0_2 = arith.constant 0 : index
    %c0_3 = arith.constant 0 : index
    %8 = vector.load %arg2[%c0_2, %c0_3] : memref<136x32xbf16, #tpu.memory_space<vmem>>, vector<128x32xbf16>
    %cst = arith.constant dense<0.000000e+00> : vector<8x32xf32>
    %9 = tpu.matmul %7, %8, %cst {dimension_numbers = #tpu.dot_dimension_numbers<[1], [0], [0], [1], [0, 0, 1, 1], [], []>} : vector<8x128xbf16>, vector<128x32xbf16>, vector<8x32xf32> -> vector<8x32xf32>
    %c128 = arith.constant 128 : index
    %c0_4 = arith.constant 0 : index
    %10 = vector.load %arg2[%c128, %c0_4] : memref<136x32xbf16, #tpu.memory_space<vmem>>, vector<8x32xbf16>
    %11 = arith.extf %10 : vector<8x32xbf16> to vector<8x32xf32>
    %12 = arith.addf %9, %11 : vector<8x32xf32>
    %13 = tpu.iota {dimensions = array<i32: 0>} : vector<8x8xi32>
    %14 = tpu.iota {dimensions = array<i32: 1>} : vector<8x8xi32>
    %15 = arith.cmpi sle, %14, %13 : vector<8x8xi32>
    %cst_5 = arith.constant 0.000000e+00 : f32
    %cst_6 = arith.constant -1.000000e+30 : f32
    %16 = vector.broadcast %cst_5 : f32 to vector<8x8xf32>
    %17 = vector.broadcast %cst_6 : f32 to vector<8x8xf32>
    %18 = arith.select %15, %16, %17 : vector<8x8xi1>, vector<8x8xf32>
    %c0_7 = arith.constant 0 : index
    %c0_8 = arith.constant 0 : index
    %19 = vector.load %arg5[%c0_7, %c0_8] : memref<17x128xf32, #tpu.memory_space<vmem>>, vector<1x32xf32>
    %c1 = arith.constant 1 : index
    %c0_9 = arith.constant 0 : index
    %20 = vector.load %arg5[%c1, %c0_9] : memref<17x128xf32, #tpu.memory_space<vmem>>, vector<1x32xf32>
    %c2 = arith.constant 2 : index
    %c0_10 = arith.constant 0 : index
    %21 = vector.load %arg5[%c2, %c0_10] : memref<17x128xf32, #tpu.memory_space<vmem>>, vector<1x32xf32>
    %c3 = arith.constant 3 : index
    %c0_11 = arith.constant 0 : index
    %22 = vector.load %arg5[%c3, %c0_11] : memref<17x128xf32, #tpu.memory_space<vmem>>, vector<1x32xf32>
    %c4 = arith.constant 4 : index
    %c0_12 = arith.constant 0 : index
    %23 = vector.load %arg5[%c4, %c0_12] : memref<17x128xf32, #tpu.memory_space<vmem>>, vector<1x32xf32>
    %c5 = arith.constant 5 : index
    %c0_13 = arith.constant 0 : index
    %24 = vector.load %arg5[%c5, %c0_13] : memref<17x128xf32, #tpu.memory_space<vmem>>, vector<1x32xf32>
    %c6 = arith.constant 6 : index
    %c0_14 = arith.constant 0 : index
    %25 = vector.load %arg5[%c6, %c0_14] : memref<17x128xf32, #tpu.memory_space<vmem>>, vector<1x128xf32>
    %c0_15 = arith.constant 0 : index
    %c0_16 = arith.constant 0 : index
    %c0_17 = arith.constant 0 : index
    %26 = vector.load %arg3[%c0_15, %c0_16, %c0_17] : memref<2x32x256xbf16, #tpu.memory_space<vmem>>, vector<1x32x96xbf16>
    %27 = vector.shape_cast %26 : vector<1x32x96xbf16> to vector<32x96xbf16>
    %c0_18 = arith.constant 0 : index
    %c0_19 = arith.constant 0 : index
    %c96 = arith.constant 96 : index
    %28 = vector.load %arg3[%c0_18, %c0_19, %c96] : memref<2x32x256xbf16, #tpu.memory_space<vmem>>, vector<1x32x32xbf16>
    %29 = vector.shape_cast %28 : vector<1x32x32xbf16> to vector<32x32xbf16>
    %c0_20 = arith.constant 0 : index
    %c0_21 = arith.constant 0 : index
    %c128_22 = arith.constant 128 : index
    %30 = vector.load %arg3[%c0_20, %c0_21, %c128_22] : memref<2x32x256xbf16, #tpu.memory_space<vmem>>, vector<1x32x128xbf16>
    %31 = vector.shape_cast %30 : vector<1x32x128xbf16> to vector<32x128xbf16>
    %c0_23 = arith.constant 0 : index
    %c0_24 = arith.constant 0 : index
    %c0_25 = arith.constant 0 : index
    %32 = vector.load %arg4[%c0_23, %c0_24, %c0_25] : memref<2x128x32xbf16, #tpu.memory_space<vmem>>, vector<1x128x32xbf16>
    %33 = vector.shape_cast %32 : vector<1x128x32xbf16> to vector<128x32xbf16>
    %cst_26 = arith.constant dense<0.000000e+00> : vector<8xf32>
    %34 = vector.multi_reduction <add>, %12, %cst_26 [1] : vector<8x32xf32> to vector<8xf32>
    %35 = vector.shape_cast %34 : vector<8xf32> to vector<8x1xf32>
    %cst_27 = arith.constant 3.200000e+01 : f32
    %36 = vector.broadcast %cst_27 : f32 to vector<8x1xf32>
    %37 = arith.divf %35, %36 : vector<8x1xf32>
    %38 = vector.broadcast %37 : vector<8x1xf32> to vector<8x32xf32>
    %39 = arith.subf %12, %38 : vector<8x32xf32>
    %40 = arith.mulf %39, %39 : vector<8x32xf32>
    %cst_28 = arith.constant dense<0.000000e+00> : vector<8xf32>
    %41 = vector.multi_reduction <add>, %40, %cst_28 [1] : vector<8x32xf32> to vector<8xf32>
    %42 = vector.shape_cast %41 : vector<8xf32> to vector<8x1xf32>
    %cst_29 = arith.constant 3.200000e+01 : f32
    %43 = vector.broadcast %cst_29 : f32 to vector<8x1xf32>
    %44 = arith.divf %42, %43 : vector<8x1xf32>
    %cst_30 = arith.constant 9.99999974E-6 : f32
    %45 = vector.broadcast %cst_30 : f32 to vector<8x1xf32>
    %46 = arith.addf %44, %45 : vector<8x1xf32>
    %47 = math.rsqrt %46 : vector<8x1xf32>
    %48 = vector.broadcast %37 : vector<8x1xf32> to vector<8x32xf32>
    %49 = arith.subf %12, %48 : vector<8x32xf32>
    %50 = vector.broadcast %47 : vector<8x1xf32> to vector<8x32xf32>
    %51 = arith.mulf %49, %50 : vector<8x32xf32>
    %52 = vector.broadcast %19 : vector<1x32xf32> to vector<8x32xf32>
    %53 = arith.mulf %51, %52 : vector<8x32xf32>
    %54 = vector.broadcast %20 : vector<1x32xf32> to vector<8x32xf32>
    %55 = arith.addf %53, %54 : vector<8x32xf32>
    %56 = arith.truncf %55 : vector<8x32xf32> to vector<8x32xbf16>
    %cst_31 = arith.constant dense<0.000000e+00> : vector<8x96xf32>
    %57 = tpu.matmul %56, %27, %cst_31 {dimension_numbers = #tpu.dot_dimension_numbers<[1], [0], [0], [1], [0, 0, 1, 1], [], []>} : vector<8x32xbf16>, vector<32x96xbf16>, vector<8x96xf32> -> vector<8x96xf32>
    %58 = vector.extract_strided_slice %57 {offsets = [0, 0], sizes = [8, 8], strides = [1, 1]} : vector<8x96xf32> to vector<8x8xf32>
    %59 = arith.truncf %58 : vector<8x8xf32> to vector<8x8xbf16>
    %60 = vector.extract_strided_slice %57 {offsets = [0, 32], sizes = [8, 8], strides = [1, 1]} : vector<8x96xf32> to vector<8x8xf32>
    %61 = arith.truncf %60 : vector<8x8xf32> to vector<8x8xbf16>
    %62 = vector.extract_strided_slice %57 {offsets = [0, 64], sizes = [8, 8], strides = [1, 1]} : vector<8x96xf32> to vector<8x8xf32>
    %63 = arith.truncf %62 : vector<8x8xf32> to vector<8x8xbf16>
    "tpu.trace_start"() <{level = 10 : i32, message = "qd,kd->qk"}> : () -> ()
    %cst_32 = arith.constant dense<0.000000e+00> : vector<8x8xf32>
    %64 = tpu.matmul %59, %61, %cst_32 {dimension_numbers = #tpu.dot_dimension_numbers<[1], [1], [0], [0], [0, 0, 1, 0], [], []>} : vector<8x8xbf16>, vector<8x8xbf16>, vector<8x8xf32> -> vector<8x8xf32>
    "tpu.trace_stop"() : () -> ()
    %65 = arith.addf %64, %18 : vector<8x8xf32>
    %cst_33 = arith.constant dense<0xFF800000> : vector<8xf32>
    %66 = vector.multi_reduction <maximumf>, %65, %cst_33 [1] : vector<8x8xf32> to vector<8xf32>
    %67 = vector.shape_cast %66 : vector<8xf32> to vector<8x1xf32>
    %68 = vector.broadcast %67 : vector<8x1xf32> to vector<8x8xf32>
    %69 = arith.subf %65, %68 : vector<8x8xf32>
    %70 = math.exp %69 : vector<8x8xf32>
    %cst_34 = arith.constant dense<0.000000e+00> : vector<8xf32>
    %71 = vector.multi_reduction <add>, %70, %cst_34 [1] : vector<8x8xf32> to vector<8xf32>
    %72 = vector.shape_cast %71 : vector<8xf32> to vector<8x1xf32>
    %73 = tpu.reciprocal %72 {approx = true} : vector<8x1xf32> -> vector<8x1xf32>
    %74 = vector.broadcast %73 : vector<8x1xf32> to vector<8x8xf32>
    %75 = arith.mulf %70, %74 : vector<8x8xf32>
    %76 = arith.truncf %75 : vector<8x8xf32> to vector<8x8xbf16>
    %cst_35 = arith.constant dense<0.000000e+00> : vector<8x8xf32>
    %77 = tpu.matmul %76, %63, %cst_35 {dimension_numbers = #tpu.dot_dimension_numbers<[1], [0], [0], [1], [0, 0, 1, 1], [], []>} : vector<8x8xbf16>, vector<8x8xbf16>, vector<8x8xf32> -> vector<8x8xf32>
    %78 = arith.truncf %77 : vector<8x8xf32> to vector<8x8xbf16>
    %79 = vector.extract_strided_slice %29 {offsets = [0, 0], sizes = [8, 32], strides = [1, 1]} : vector<32x32xbf16> to vector<8x32xbf16>
    %cst_36 = arith.constant dense<0.000000e+00> : vector<8x32xf32>
    %80 = tpu.matmul %78, %79, %cst_36 {dimension_numbers = #tpu.dot_dimension_numbers<[1], [0], [0], [1], [0, 0, 1, 1], [], []>} : vector<8x8xbf16>, vector<8x32xbf16>, vector<8x32xf32> -> vector<8x32xf32>
    %81 = vector.extract_strided_slice %57 {offsets = [0, 8], sizes = [8, 8], strides = [1, 1]} : vector<8x96xf32> to vector<8x8xf32>
    %82 = arith.truncf %81 : vector<8x8xf32> to vector<8x8xbf16>
    %83 = vector.extract_strided_slice %57 {offsets = [0, 40], sizes = [8, 8], strides = [1, 1]} : vector<8x96xf32> to vector<8x8xf32>
    %84 = arith.truncf %83 : vector<8x8xf32> to vector<8x8xbf16>
    %85 = vector.extract_strided_slice %57 {offsets = [0, 72], sizes = [8, 8], strides = [1, 1]} : vector<8x96xf32> to vector<8x8xf32>
    %86 = arith.truncf %85 : vector<8x8xf32> to vector<8x8xbf16>
    "tpu.trace_start"() <{level = 10 : i32, message = "qd,kd->qk"}> : () -> ()
    %cst_37 = arith.constant dense<0.000000e+00> : vector<8x8xf32>
    %87 = tpu.matmul %82, %84, %cst_37 {dimension_numbers = #tpu.dot_dimension_numbers<[1], [1], [0], [0], [0, 0, 1, 0], [], []>} : vector<8x8xbf16>, vector<8x8xbf16>, vector<8x8xf32> -> vector<8x8xf32>
    "tpu.trace_stop"() : () -> ()
    %88 = arith.addf %87, %18 : vector<8x8xf32>
    %cst_38 = arith.constant dense<0xFF800000> : vector<8xf32>
    %89 = vector.multi_reduction <maximumf>, %88, %cst_38 [1] : vector<8x8xf32> to vector<8xf32>
    %90 = vector.shape_cast %89 : vector<8xf32> to vector<8x1xf32>
    %91 = vector.broadcast %90 : vector<8x1xf32> to vector<8x8xf32>
    %92 = arith.subf %88, %91 : vector<8x8xf32>
    %93 = math.exp %92 : vector<8x8xf32>
    %cst_39 = arith.constant dense<0.000000e+00> : vector<8xf32>
    %94 = vector.multi_reduction <add>, %93, %cst_39 [1] : vector<8x8xf32> to vector<8xf32>
    %95 = vector.shape_cast %94 : vector<8xf32> to vector<8x1xf32>
    %96 = tpu.reciprocal %95 {approx = true} : vector<8x1xf32> -> vector<8x1xf32>
    %97 = vector.broadcast %96 : vector<8x1xf32> to vector<8x8xf32>
    %98 = arith.mulf %93, %97 : vector<8x8xf32>
    %99 = arith.truncf %98 : vector<8x8xf32> to vector<8x8xbf16>
    %cst_40 = arith.constant dense<0.000000e+00> : vector<8x8xf32>
    %100 = tpu.matmul %99, %86, %cst_40 {dimension_numbers = #tpu.dot_dimension_numbers<[1], [0], [0], [1], [0, 0, 1, 1], [], []>} : vector<8x8xbf16>, vector<8x8xbf16>, vector<8x8xf32> -> vector<8x8xf32>
    %101 = arith.truncf %100 : vector<8x8xf32> to vector<8x8xbf16>
    %102 = vector.extract_strided_slice %29 {offsets = [8, 0], sizes = [8, 32], strides = [1, 1]} : vector<32x32xbf16> to vector<8x32xbf16>
    %cst_41 = arith.constant dense<0.000000e+00> : vector<8x32xf32>
    %103 = tpu.matmul %101, %102, %cst_41 {dimension_numbers = #tpu.dot_dimension_numbers<[1], [0], [0], [1], [0, 0, 1, 1], [], []>} : vector<8x8xbf16>, vector<8x32xbf16>, vector<8x32xf32> -> vector<8x32xf32>
    %104 = arith.addf %80, %103 : vector<8x32xf32>
    %105 = vector.extract_strided_slice %57 {offsets = [0, 16], sizes = [8, 8], strides = [1, 1]} : vector<8x96xf32> to vector<8x8xf32>
    %106 = arith.truncf %105 : vector<8x8xf32> to vector<8x8xbf16>
    %107 = vector.extract_strided_slice %57 {offsets = [0, 48], sizes = [8, 8], strides = [1, 1]} : vector<8x96xf32> to vector<8x8xf32>
    %108 = arith.truncf %107 : vector<8x8xf32> to vector<8x8xbf16>
    %109 = vector.extract_strided_slice %57 {offsets = [0, 80], sizes = [8, 8], strides = [1, 1]} : vector<8x96xf32> to vector<8x8xf32>
    %110 = arith.truncf %109 : vector<8x8xf32> to vector<8x8xbf16>
    "tpu.trace_start"() <{level = 10 : i32, message = "qd,kd->qk"}> : () -> ()
    %cst_42 = arith.constant dense<0.000000e+00> : vector<8x8xf32>
    %111 = tpu.matmul %106, %108, %cst_42 {dimension_numbers = #tpu.dot_dimension_numbers<[1], [1], [0], [0], [0, 0, 1, 0], [], []>} : vector<8x8xbf16>, vector<8x8xbf16>, vector<8x8xf32> -> vector<8x8xf32>
    "tpu.trace_stop"() : () -> ()
    %112 = arith.addf %111, %18 : vector<8x8xf32>
    %cst_43 = arith.constant dense<0xFF800000> : vector<8xf32>
    %113 = vector.multi_reduction <maximumf>, %112, %cst_43 [1] : vector<8x8xf32> to vector<8xf32>
    %114 = vector.shape_cast %113 : vector<8xf32> to vector<8x1xf32>
    %115 = vector.broadcast %114 : vector<8x1xf32> to vector<8x8xf32>
    %116 = arith.subf %112, %115 : vector<8x8xf32>
    %117 = math.exp %116 : vector<8x8xf32>
    %cst_44 = arith.constant dense<0.000000e+00> : vector<8xf32>
    %118 = vector.multi_reduction <add>, %117, %cst_44 [1] : vector<8x8xf32> to vector<8xf32>
    %119 = vector.shape_cast %118 : vector<8xf32> to vector<8x1xf32>
    %120 = tpu.reciprocal %119 {approx = true} : vector<8x1xf32> -> vector<8x1xf32>
    %121 = vector.broadcast %120 : vector<8x1xf32> to vector<8x8xf32>
    %122 = arith.mulf %117, %121 : vector<8x8xf32>
    %123 = arith.truncf %122 : vector<8x8xf32> to vector<8x8xbf16>
    %cst_45 = arith.constant dense<0.000000e+00> : vector<8x8xf32>
    %124 = tpu.matmul %123, %110, %cst_45 {dimension_numbers = #tpu.dot_dimension_numbers<[1], [0], [0], [1], [0, 0, 1, 1], [], []>} : vector<8x8xbf16>, vector<8x8xbf16>, vector<8x8xf32> -> vector<8x8xf32>
    %125 = arith.truncf %124 : vector<8x8xf32> to vector<8x8xbf16>
    %126 = vector.extract_strided_slice %29 {offsets = [16, 0], sizes = [8, 32], strides = [1, 1]} : vector<32x32xbf16> to vector<8x32xbf16>
    %cst_46 = arith.constant dense<0.000000e+00> : vector<8x32xf32>
    %127 = tpu.matmul %125, %126, %cst_46 {dimension_numbers = #tpu.dot_dimension_numbers<[1], [0], [0], [1], [0, 0, 1, 1], [], []>} : vector<8x8xbf16>, vector<8x32xbf16>, vector<8x32xf32> -> vector<8x32xf32>
    %128 = arith.addf %104, %127 : vector<8x32xf32>
    %129 = vector.extract_strided_slice %57 {offsets = [0, 24], sizes = [8, 8], strides = [1, 1]} : vector<8x96xf32> to vector<8x8xf32>
    %130 = arith.truncf %129 : vector<8x8xf32> to vector<8x8xbf16>
    %131 = vector.extract_strided_slice %57 {offsets = [0, 56], sizes = [8, 8], strides = [1, 1]} : vector<8x96xf32> to vector<8x8xf32>
    %132 = arith.truncf %131 : vector<8x8xf32> to vector<8x8xbf16>
    %133 = vector.extract_strided_slice %57 {offsets = [0, 88], sizes = [8, 8], strides = [1, 1]} : vector<8x96xf32> to vector<8x8xf32>
    %134 = arith.truncf %133 : vector<8x8xf32> to vector<8x8xbf16>
    "tpu.trace_start"() <{level = 10 : i32, message = "qd,kd->qk"}> : () -> ()
    %cst_47 = arith.constant dense<0.000000e+00> : vector<8x8xf32>
    %135 = tpu.matmul %130, %132, %cst_47 {dimension_numbers = #tpu.dot_dimension_numbers<[1], [1], [0], [0], [0, 0, 1, 0], [], []>} : vector<8x8xbf16>, vector<8x8xbf16>, vector<8x8xf32> -> vector<8x8xf32>
    "tpu.trace_stop"() : () -> ()
    %136 = arith.addf %135, %18 : vector<8x8xf32>
    %cst_48 = arith.constant dense<0xFF800000> : vector<8xf32>
    %137 = vector.multi_reduction <maximumf>, %136, %cst_48 [1] : vector<8x8xf32> to vector<8xf32>
    %138 = vector.shape_cast %137 : vector<8xf32> to vector<8x1xf32>
    %139 = vector.broadcast %138 : vector<8x1xf32> to vector<8x8xf32>
    %140 = arith.subf %136, %139 : vector<8x8xf32>
    %141 = math.exp %140 : vector<8x8xf32>
    %cst_49 = arith.constant dense<0.000000e+00> : vector<8xf32>
    %142 = vector.multi_reduction <add>, %141, %cst_49 [1] : vector<8x8xf32> to vector<8xf32>
    %143 = vector.shape_cast %142 : vector<8xf32> to vector<8x1xf32>
    %144 = tpu.reciprocal %143 {approx = true} : vector<8x1xf32> -> vector<8x1xf32>
    %145 = vector.broadcast %144 : vector<8x1xf32> to vector<8x8xf32>
    %146 = arith.mulf %141, %145 : vector<8x8xf32>
    %147 = arith.truncf %146 : vector<8x8xf32> to vector<8x8xbf16>
    %cst_50 = arith.constant dense<0.000000e+00> : vector<8x8xf32>
    %148 = tpu.matmul %147, %134, %cst_50 {dimension_numbers = #tpu.dot_dimension_numbers<[1], [0], [0], [1], [0, 0, 1, 1], [], []>} : vector<8x8xbf16>, vector<8x8xbf16>, vector<8x8xf32> -> vector<8x8xf32>
    %149 = arith.truncf %148 : vector<8x8xf32> to vector<8x8xbf16>
    %150 = vector.extract_strided_slice %29 {offsets = [24, 0], sizes = [8, 32], strides = [1, 1]} : vector<32x32xbf16> to vector<8x32xbf16>
    %cst_51 = arith.constant dense<0.000000e+00> : vector<8x32xf32>
    %151 = tpu.matmul %149, %150, %cst_51 {dimension_numbers = #tpu.dot_dimension_numbers<[1], [0], [0], [1], [0, 0, 1, 1], [], []>} : vector<8x8xbf16>, vector<8x32xbf16>, vector<8x32xf32> -> vector<8x32xf32>
    %152 = arith.addf %128, %151 : vector<8x32xf32>
    %153 = arith.addf %12, %152 : vector<8x32xf32>
    %154 = vector.broadcast %21 : vector<1x32xf32> to vector<8x32xf32>
    %155 = arith.addf %153, %154 : vector<8x32xf32>
    %cst_52 = arith.constant dense<0.000000e+00> : vector<8xf32>
    %156 = vector.multi_reduction <add>, %155, %cst_52 [1] : vector<8x32xf32> to vector<8xf32>
    %157 = vector.shape_cast %156 : vector<8xf32> to vector<8x1xf32>
    %cst_53 = arith.constant 3.200000e+01 : f32
    %158 = vector.broadcast %cst_53 : f32 to vector<8x1xf32>
    %159 = arith.divf %157, %158 : vector<8x1xf32>
    %160 = vector.broadcast %159 : vector<8x1xf32> to vector<8x32xf32>
    %161 = arith.subf %155, %160 : vector<8x32xf32>
    %162 = arith.mulf %161, %161 : vector<8x32xf32>
    %cst_54 = arith.constant dense<0.000000e+00> : vector<8xf32>
    %163 = vector.multi_reduction <add>, %162, %cst_54 [1] : vector<8x32xf32> to vector<8xf32>
    %164 = vector.shape_cast %163 : vector<8xf32> to vector<8x1xf32>
    %cst_55 = arith.constant 3.200000e+01 : f32
    %165 = vector.broadcast %cst_55 : f32 to vector<8x1xf32>
    %166 = arith.divf %164, %165 : vector<8x1xf32>
    %cst_56 = arith.constant 9.99999974E-6 : f32
    %167 = vector.broadcast %cst_56 : f32 to vector<8x1xf32>
    %168 = arith.addf %166, %167 : vector<8x1xf32>
    %169 = math.rsqrt %168 : vector<8x1xf32>
    %170 = vector.broadcast %159 : vector<8x1xf32> to vector<8x32xf32>
    %171 = arith.subf %155, %170 : vector<8x32xf32>
    %172 = vector.broadcast %169 : vector<8x1xf32> to vector<8x32xf32>
    %173 = arith.mulf %171, %172 : vector<8x32xf32>
    %174 = vector.broadcast %22 : vector<1x32xf32> to vector<8x32xf32>
    %175 = arith.mulf %173, %174 : vector<8x32xf32>
    %176 = vector.broadcast %23 : vector<1x32xf32> to vector<8x32xf32>
    %177 = arith.addf %175, %176 : vector<8x32xf32>
    %178 = arith.truncf %177 : vector<8x32xf32> to vector<8x32xbf16>
    %cst_57 = arith.constant dense<0.000000e+00> : vector<8x128xf32>
    %179 = tpu.matmul %178, %31, %cst_57 {dimension_numbers = #tpu.dot_dimension_numbers<[1], [0], [0], [1], [0, 0, 1, 1], [], []>} : vector<8x32xbf16>, vector<32x128xbf16>, vector<8x128xf32> -> vector<8x128xf32>
    %180 = vector.broadcast %25 : vector<1x128xf32> to vector<8x128xf32>
    %181 = arith.addf %179, %180 : vector<8x128xf32>
    %cst_58 = arith.constant 0.000000e+00 : f32
    %182 = vector.broadcast %cst_58 : f32 to vector<8x128xf32>
    %183 = arith.maximumf %181, %182 : vector<8x128xf32>
    %184 = arith.truncf %183 : vector<8x128xf32> to vector<8x128xbf16>
    %cst_59 = arith.constant dense<0.000000e+00> : vector<8x32xf32>
    %185 = tpu.matmul %184, %33, %cst_59 {dimension_numbers = #tpu.dot_dimension_numbers<[1], [0], [0], [1], [0, 0, 1, 1], [], []>} : vector<8x128xbf16>, vector<128x32xbf16>, vector<8x32xf32> -> vector<8x32xf32>
    %186 = arith.addf %155, %185 : vector<8x32xf32>
    %187 = vector.broadcast %24 : vector<1x32xf32> to vector<8x32xf32>
    %188 = arith.addf %186, %187 : vector<8x32xf32>
    %c7 = arith.constant 7 : index
    %c0_60 = arith.constant 0 : index
    %189 = vector.load %arg5[%c7, %c0_60] : memref<17x128xf32, #tpu.memory_space<vmem>>, vector<1x32xf32>
    %c8 = arith.constant 8 : index
    %c0_61 = arith.constant 0 : index
    %190 = vector.load %arg5[%c8, %c0_61] : memref<17x128xf32, #tpu.memory_space<vmem>>, vector<1x32xf32>
    %c9 = arith.constant 9 : index
    %c0_62 = arith.constant 0 : index
    %191 = vector.load %arg5[%c9, %c0_62] : memref<17x128xf32, #tpu.memory_space<vmem>>, vector<1x32xf32>
    %c10 = arith.constant 10 : index
    %c0_63 = arith.constant 0 : index
    %192 = vector.load %arg5[%c10, %c0_63] : memref<17x128xf32, #tpu.memory_space<vmem>>, vector<1x32xf32>
    %c11 = arith.constant 11 : index
    %c0_64 = arith.constant 0 : index
    %193 = vector.load %arg5[%c11, %c0_64] : memref<17x128xf32, #tpu.memory_space<vmem>>, vector<1x32xf32>
    %c12 = arith.constant 12 : index
    %c0_65 = arith.constant 0 : index
    %194 = vector.load %arg5[%c12, %c0_65] : memref<17x128xf32, #tpu.memory_space<vmem>>, vector<1x32xf32>
    %c13 = arith.constant 13 : index
    %c0_66 = arith.constant 0 : index
    %195 = vector.load %arg5[%c13, %c0_66] : memref<17x128xf32, #tpu.memory_space<vmem>>, vector<1x128xf32>
    %c1_67 = arith.constant 1 : index
    %c0_68 = arith.constant 0 : index
    %c0_69 = arith.constant 0 : index
    %196 = vector.load %arg3[%c1_67, %c0_68, %c0_69] : memref<2x32x256xbf16, #tpu.memory_space<vmem>>, vector<1x32x96xbf16>
    %197 = vector.shape_cast %196 : vector<1x32x96xbf16> to vector<32x96xbf16>
    %c1_70 = arith.constant 1 : index
    %c0_71 = arith.constant 0 : index
    %c96_72 = arith.constant 96 : index
    %198 = vector.load %arg3[%c1_70, %c0_71, %c96_72] : memref<2x32x256xbf16, #tpu.memory_space<vmem>>, vector<1x32x32xbf16>
    %199 = vector.shape_cast %198 : vector<1x32x32xbf16> to vector<32x32xbf16>
    %c1_73 = arith.constant 1 : index
    %c0_74 = arith.constant 0 : index
    %c128_75 = arith.constant 128 : index
    %200 = vector.load %arg3[%c1_73, %c0_74, %c128_75] : memref<2x32x256xbf16, #tpu.memory_space<vmem>>, vector<1x32x128xbf16>
    %201 = vector.shape_cast %200 : vector<1x32x128xbf16> to vector<32x128xbf16>
    %c1_76 = arith.constant 1 : index
    %c0_77 = arith.constant 0 : index
    %c0_78 = arith.constant 0 : index
    %202 = vector.load %arg4[%c1_76, %c0_77, %c0_78] : memref<2x128x32xbf16, #tpu.memory_space<vmem>>, vector<1x128x32xbf16>
    %203 = vector.shape_cast %202 : vector<1x128x32xbf16> to vector<128x32xbf16>
    %cst_79 = arith.constant dense<0.000000e+00> : vector<8xf32>
    %204 = vector.multi_reduction <add>, %188, %cst_79 [1] : vector<8x32xf32> to vector<8xf32>
    %205 = vector.shape_cast %204 : vector<8xf32> to vector<8x1xf32>
    %cst_80 = arith.constant 3.200000e+01 : f32
    %206 = vector.broadcast %cst_80 : f32 to vector<8x1xf32>
    %207 = arith.divf %205, %206 : vector<8x1xf32>
    %208 = vector.broadcast %207 : vector<8x1xf32> to vector<8x32xf32>
    %209 = arith.subf %188, %208 : vector<8x32xf32>
    %210 = arith.mulf %209, %209 : vector<8x32xf32>
    %cst_81 = arith.constant dense<0.000000e+00> : vector<8xf32>
    %211 = vector.multi_reduction <add>, %210, %cst_81 [1] : vector<8x32xf32> to vector<8xf32>
    %212 = vector.shape_cast %211 : vector<8xf32> to vector<8x1xf32>
    %cst_82 = arith.constant 3.200000e+01 : f32
    %213 = vector.broadcast %cst_82 : f32 to vector<8x1xf32>
    %214 = arith.divf %212, %213 : vector<8x1xf32>
    %cst_83 = arith.constant 9.99999974E-6 : f32
    %215 = vector.broadcast %cst_83 : f32 to vector<8x1xf32>
    %216 = arith.addf %214, %215 : vector<8x1xf32>
    %217 = math.rsqrt %216 : vector<8x1xf32>
    %218 = vector.broadcast %207 : vector<8x1xf32> to vector<8x32xf32>
    %219 = arith.subf %188, %218 : vector<8x32xf32>
    %220 = vector.broadcast %217 : vector<8x1xf32> to vector<8x32xf32>
    %221 = arith.mulf %219, %220 : vector<8x32xf32>
    %222 = vector.broadcast %189 : vector<1x32xf32> to vector<8x32xf32>
    %223 = arith.mulf %221, %222 : vector<8x32xf32>
    %224 = vector.broadcast %190 : vector<1x32xf32> to vector<8x32xf32>
    %225 = arith.addf %223, %224 : vector<8x32xf32>
    %226 = arith.truncf %225 : vector<8x32xf32> to vector<8x32xbf16>
    %cst_84 = arith.constant dense<0.000000e+00> : vector<8x96xf32>
    %227 = tpu.matmul %226, %197, %cst_84 {dimension_numbers = #tpu.dot_dimension_numbers<[1], [0], [0], [1], [0, 0, 1, 1], [], []>} : vector<8x32xbf16>, vector<32x96xbf16>, vector<8x96xf32> -> vector<8x96xf32>
    %228 = vector.extract_strided_slice %227 {offsets = [0, 0], sizes = [8, 8], strides = [1, 1]} : vector<8x96xf32> to vector<8x8xf32>
    %229 = arith.truncf %228 : vector<8x8xf32> to vector<8x8xbf16>
    %230 = vector.extract_strided_slice %227 {offsets = [0, 32], sizes = [8, 8], strides = [1, 1]} : vector<8x96xf32> to vector<8x8xf32>
    %231 = arith.truncf %230 : vector<8x8xf32> to vector<8x8xbf16>
    %232 = vector.extract_strided_slice %227 {offsets = [0, 64], sizes = [8, 8], strides = [1, 1]} : vector<8x96xf32> to vector<8x8xf32>
    %233 = arith.truncf %232 : vector<8x8xf32> to vector<8x8xbf16>
    "tpu.trace_start"() <{level = 10 : i32, message = "qd,kd->qk"}> : () -> ()
    %cst_85 = arith.constant dense<0.000000e+00> : vector<8x8xf32>
    %234 = tpu.matmul %229, %231, %cst_85 {dimension_numbers = #tpu.dot_dimension_numbers<[1], [1], [0], [0], [0, 0, 1, 0], [], []>} : vector<8x8xbf16>, vector<8x8xbf16>, vector<8x8xf32> -> vector<8x8xf32>
    "tpu.trace_stop"() : () -> ()
    %235 = arith.addf %234, %18 : vector<8x8xf32>
    %cst_86 = arith.constant dense<0xFF800000> : vector<8xf32>
    %236 = vector.multi_reduction <maximumf>, %235, %cst_86 [1] : vector<8x8xf32> to vector<8xf32>
    %237 = vector.shape_cast %236 : vector<8xf32> to vector<8x1xf32>
    %238 = vector.broadcast %237 : vector<8x1xf32> to vector<8x8xf32>
    %239 = arith.subf %235, %238 : vector<8x8xf32>
    %240 = math.exp %239 : vector<8x8xf32>
    %cst_87 = arith.constant dense<0.000000e+00> : vector<8xf32>
    %241 = vector.multi_reduction <add>, %240, %cst_87 [1] : vector<8x8xf32> to vector<8xf32>
    %242 = vector.shape_cast %241 : vector<8xf32> to vector<8x1xf32>
    %243 = tpu.reciprocal %242 {approx = true} : vector<8x1xf32> -> vector<8x1xf32>
    %244 = vector.broadcast %243 : vector<8x1xf32> to vector<8x8xf32>
    %245 = arith.mulf %240, %244 : vector<8x8xf32>
    %246 = arith.truncf %245 : vector<8x8xf32> to vector<8x8xbf16>
    %cst_88 = arith.constant dense<0.000000e+00> : vector<8x8xf32>
    %247 = tpu.matmul %246, %233, %cst_88 {dimension_numbers = #tpu.dot_dimension_numbers<[1], [0], [0], [1], [0, 0, 1, 1], [], []>} : vector<8x8xbf16>, vector<8x8xbf16>, vector<8x8xf32> -> vector<8x8xf32>
    %248 = arith.truncf %247 : vector<8x8xf32> to vector<8x8xbf16>
    %249 = vector.extract_strided_slice %199 {offsets = [0, 0], sizes = [8, 32], strides = [1, 1]} : vector<32x32xbf16> to vector<8x32xbf16>
    %cst_89 = arith.constant dense<0.000000e+00> : vector<8x32xf32>
    %250 = tpu.matmul %248, %249, %cst_89 {dimension_numbers = #tpu.dot_dimension_numbers<[1], [0], [0], [1], [0, 0, 1, 1], [], []>} : vector<8x8xbf16>, vector<8x32xbf16>, vector<8x32xf32> -> vector<8x32xf32>
    %251 = vector.extract_strided_slice %227 {offsets = [0, 8], sizes = [8, 8], strides = [1, 1]} : vector<8x96xf32> to vector<8x8xf32>
    %252 = arith.truncf %251 : vector<8x8xf32> to vector<8x8xbf16>
    %253 = vector.extract_strided_slice %227 {offsets = [0, 40], sizes = [8, 8], strides = [1, 1]} : vector<8x96xf32> to vector<8x8xf32>
    %254 = arith.truncf %253 : vector<8x8xf32> to vector<8x8xbf16>
    %255 = vector.extract_strided_slice %227 {offsets = [0, 72], sizes = [8, 8], strides = [1, 1]} : vector<8x96xf32> to vector<8x8xf32>
    %256 = arith.truncf %255 : vector<8x8xf32> to vector<8x8xbf16>
    "tpu.trace_start"() <{level = 10 : i32, message = "qd,kd->qk"}> : () -> ()
    %cst_90 = arith.constant dense<0.000000e+00> : vector<8x8xf32>
    %257 = tpu.matmul %252, %254, %cst_90 {dimension_numbers = #tpu.dot_dimension_numbers<[1], [1], [0], [0], [0, 0, 1, 0], [], []>} : vector<8x8xbf16>, vector<8x8xbf16>, vector<8x8xf32> -> vector<8x8xf32>
    "tpu.trace_stop"() : () -> ()
    %258 = arith.addf %257, %18 : vector<8x8xf32>
    %cst_91 = arith.constant dense<0xFF800000> : vector<8xf32>
    %259 = vector.multi_reduction <maximumf>, %258, %cst_91 [1] : vector<8x8xf32> to vector<8xf32>
    %260 = vector.shape_cast %259 : vector<8xf32> to vector<8x1xf32>
    %261 = vector.broadcast %260 : vector<8x1xf32> to vector<8x8xf32>
    %262 = arith.subf %258, %261 : vector<8x8xf32>
    %263 = math.exp %262 : vector<8x8xf32>
    %cst_92 = arith.constant dense<0.000000e+00> : vector<8xf32>
    %264 = vector.multi_reduction <add>, %263, %cst_92 [1] : vector<8x8xf32> to vector<8xf32>
    %265 = vector.shape_cast %264 : vector<8xf32> to vector<8x1xf32>
    %266 = tpu.reciprocal %265 {approx = true} : vector<8x1xf32> -> vector<8x1xf32>
    %267 = vector.broadcast %266 : vector<8x1xf32> to vector<8x8xf32>
    %268 = arith.mulf %263, %267 : vector<8x8xf32>
    %269 = arith.truncf %268 : vector<8x8xf32> to vector<8x8xbf16>
    %cst_93 = arith.constant dense<0.000000e+00> : vector<8x8xf32>
    %270 = tpu.matmul %269, %256, %cst_93 {dimension_numbers = #tpu.dot_dimension_numbers<[1], [0], [0], [1], [0, 0, 1, 1], [], []>} : vector<8x8xbf16>, vector<8x8xbf16>, vector<8x8xf32> -> vector<8x8xf32>
    %271 = arith.truncf %270 : vector<8x8xf32> to vector<8x8xbf16>
    %272 = vector.extract_strided_slice %199 {offsets = [8, 0], sizes = [8, 32], strides = [1, 1]} : vector<32x32xbf16> to vector<8x32xbf16>
    %cst_94 = arith.constant dense<0.000000e+00> : vector<8x32xf32>
    %273 = tpu.matmul %271, %272, %cst_94 {dimension_numbers = #tpu.dot_dimension_numbers<[1], [0], [0], [1], [0, 0, 1, 1], [], []>} : vector<8x8xbf16>, vector<8x32xbf16>, vector<8x32xf32> -> vector<8x32xf32>
    %274 = arith.addf %250, %273 : vector<8x32xf32>
    %275 = vector.extract_strided_slice %227 {offsets = [0, 16], sizes = [8, 8], strides = [1, 1]} : vector<8x96xf32> to vector<8x8xf32>
    %276 = arith.truncf %275 : vector<8x8xf32> to vector<8x8xbf16>
    %277 = vector.extract_strided_slice %227 {offsets = [0, 48], sizes = [8, 8], strides = [1, 1]} : vector<8x96xf32> to vector<8x8xf32>
    %278 = arith.truncf %277 : vector<8x8xf32> to vector<8x8xbf16>
    %279 = vector.extract_strided_slice %227 {offsets = [0, 80], sizes = [8, 8], strides = [1, 1]} : vector<8x96xf32> to vector<8x8xf32>
    %280 = arith.truncf %279 : vector<8x8xf32> to vector<8x8xbf16>
    "tpu.trace_start"() <{level = 10 : i32, message = "qd,kd->qk"}> : () -> ()
    %cst_95 = arith.constant dense<0.000000e+00> : vector<8x8xf32>
    %281 = tpu.matmul %276, %278, %cst_95 {dimension_numbers = #tpu.dot_dimension_numbers<[1], [1], [0], [0], [0, 0, 1, 0], [], []>} : vector<8x8xbf16>, vector<8x8xbf16>, vector<8x8xf32> -> vector<8x8xf32>
    "tpu.trace_stop"() : () -> ()
    %282 = arith.addf %281, %18 : vector<8x8xf32>
    %cst_96 = arith.constant dense<0xFF800000> : vector<8xf32>
    %283 = vector.multi_reduction <maximumf>, %282, %cst_96 [1] : vector<8x8xf32> to vector<8xf32>
    %284 = vector.shape_cast %283 : vector<8xf32> to vector<8x1xf32>
    %285 = vector.broadcast %284 : vector<8x1xf32> to vector<8x8xf32>
    %286 = arith.subf %282, %285 : vector<8x8xf32>
    %287 = math.exp %286 : vector<8x8xf32>
    %cst_97 = arith.constant dense<0.000000e+00> : vector<8xf32>
    %288 = vector.multi_reduction <add>, %287, %cst_97 [1] : vector<8x8xf32> to vector<8xf32>
    %289 = vector.shape_cast %288 : vector<8xf32> to vector<8x1xf32>
    %290 = tpu.reciprocal %289 {approx = true} : vector<8x1xf32> -> vector<8x1xf32>
    %291 = vector.broadcast %290 : vector<8x1xf32> to vector<8x8xf32>
    %292 = arith.mulf %287, %291 : vector<8x8xf32>
    %293 = arith.truncf %292 : vector<8x8xf32> to vector<8x8xbf16>
    %cst_98 = arith.constant dense<0.000000e+00> : vector<8x8xf32>
    %294 = tpu.matmul %293, %280, %cst_98 {dimension_numbers = #tpu.dot_dimension_numbers<[1], [0], [0], [1], [0, 0, 1, 1], [], []>} : vector<8x8xbf16>, vector<8x8xbf16>, vector<8x8xf32> -> vector<8x8xf32>
    %295 = arith.truncf %294 : vector<8x8xf32> to vector<8x8xbf16>
    %296 = vector.extract_strided_slice %199 {offsets = [16, 0], sizes = [8, 32], strides = [1, 1]} : vector<32x32xbf16> to vector<8x32xbf16>
    %cst_99 = arith.constant dense<0.000000e+00> : vector<8x32xf32>
    %297 = tpu.matmul %295, %296, %cst_99 {dimension_numbers = #tpu.dot_dimension_numbers<[1], [0], [0], [1], [0, 0, 1, 1], [], []>} : vector<8x8xbf16>, vector<8x32xbf16>, vector<8x32xf32> -> vector<8x32xf32>
    %298 = arith.addf %274, %297 : vector<8x32xf32>
    %299 = vector.extract_strided_slice %227 {offsets = [0, 24], sizes = [8, 8], strides = [1, 1]} : vector<8x96xf32> to vector<8x8xf32>
    %300 = arith.truncf %299 : vector<8x8xf32> to vector<8x8xbf16>
    %301 = vector.extract_strided_slice %227 {offsets = [0, 56], sizes = [8, 8], strides = [1, 1]} : vector<8x96xf32> to vector<8x8xf32>
    %302 = arith.truncf %301 : vector<8x8xf32> to vector<8x8xbf16>
    %303 = vector.extract_strided_slice %227 {offsets = [0, 88], sizes = [8, 8], strides = [1, 1]} : vector<8x96xf32> to vector<8x8xf32>
    %304 = arith.truncf %303 : vector<8x8xf32> to vector<8x8xbf16>
    "tpu.trace_start"() <{level = 10 : i32, message = "qd,kd->qk"}> : () -> ()
    %cst_100 = arith.constant dense<0.000000e+00> : vector<8x8xf32>
    %305 = tpu.matmul %300, %302, %cst_100 {dimension_numbers = #tpu.dot_dimension_numbers<[1], [1], [0], [0], [0, 0, 1, 0], [], []>} : vector<8x8xbf16>, vector<8x8xbf16>, vector<8x8xf32> -> vector<8x8xf32>
    "tpu.trace_stop"() : () -> ()
    %306 = arith.addf %305, %18 : vector<8x8xf32>
    %cst_101 = arith.constant dense<0xFF800000> : vector<8xf32>
    %307 = vector.multi_reduction <maximumf>, %306, %cst_101 [1] : vector<8x8xf32> to vector<8xf32>
    %308 = vector.shape_cast %307 : vector<8xf32> to vector<8x1xf32>
    %309 = vector.broadcast %308 : vector<8x1xf32> to vector<8x8xf32>
    %310 = arith.subf %306, %309 : vector<8x8xf32>
    %311 = math.exp %310 : vector<8x8xf32>
    %cst_102 = arith.constant dense<0.000000e+00> : vector<8xf32>
    %312 = vector.multi_reduction <add>, %311, %cst_102 [1] : vector<8x8xf32> to vector<8xf32>
    %313 = vector.shape_cast %312 : vector<8xf32> to vector<8x1xf32>
    %314 = tpu.reciprocal %313 {approx = true} : vector<8x1xf32> -> vector<8x1xf32>
    %315 = vector.broadcast %314 : vector<8x1xf32> to vector<8x8xf32>
    %316 = arith.mulf %311, %315 : vector<8x8xf32>
    %317 = arith.truncf %316 : vector<8x8xf32> to vector<8x8xbf16>
    %cst_103 = arith.constant dense<0.000000e+00> : vector<8x8xf32>
    %318 = tpu.matmul %317, %304, %cst_103 {dimension_numbers = #tpu.dot_dimension_numbers<[1], [0], [0], [1], [0, 0, 1, 1], [], []>} : vector<8x8xbf16>, vector<8x8xbf16>, vector<8x8xf32> -> vector<8x8xf32>
    %319 = arith.truncf %318 : vector<8x8xf32> to vector<8x8xbf16>
    %320 = vector.extract_strided_slice %199 {offsets = [24, 0], sizes = [8, 32], strides = [1, 1]} : vector<32x32xbf16> to vector<8x32xbf16>
    %cst_104 = arith.constant dense<0.000000e+00> : vector<8x32xf32>
    %321 = tpu.matmul %319, %320, %cst_104 {dimension_numbers = #tpu.dot_dimension_numbers<[1], [0], [0], [1], [0, 0, 1, 1], [], []>} : vector<8x8xbf16>, vector<8x32xbf16>, vector<8x32xf32> -> vector<8x32xf32>
    %322 = arith.addf %298, %321 : vector<8x32xf32>
    %323 = arith.addf %188, %322 : vector<8x32xf32>
    %324 = vector.broadcast %191 : vector<1x32xf32> to vector<8x32xf32>
    %325 = arith.addf %323, %324 : vector<8x32xf32>
    %cst_105 = arith.constant dense<0.000000e+00> : vector<8xf32>
    %326 = vector.multi_reduction <add>, %325, %cst_105 [1] : vector<8x32xf32> to vector<8xf32>
    %327 = vector.shape_cast %326 : vector<8xf32> to vector<8x1xf32>
    %cst_106 = arith.constant 3.200000e+01 : f32
    %328 = vector.broadcast %cst_106 : f32 to vector<8x1xf32>
    %329 = arith.divf %327, %328 : vector<8x1xf32>
    %330 = vector.broadcast %329 : vector<8x1xf32> to vector<8x32xf32>
    %331 = arith.subf %325, %330 : vector<8x32xf32>
    %332 = arith.mulf %331, %331 : vector<8x32xf32>
    %cst_107 = arith.constant dense<0.000000e+00> : vector<8xf32>
    %333 = vector.multi_reduction <add>, %332, %cst_107 [1] : vector<8x32xf32> to vector<8xf32>
    %334 = vector.shape_cast %333 : vector<8xf32> to vector<8x1xf32>
    %cst_108 = arith.constant 3.200000e+01 : f32
    %335 = vector.broadcast %cst_108 : f32 to vector<8x1xf32>
    %336 = arith.divf %334, %335 : vector<8x1xf32>
    %cst_109 = arith.constant 9.99999974E-6 : f32
    %337 = vector.broadcast %cst_109 : f32 to vector<8x1xf32>
    %338 = arith.addf %336, %337 : vector<8x1xf32>
    %339 = math.rsqrt %338 : vector<8x1xf32>
    %340 = vector.broadcast %329 : vector<8x1xf32> to vector<8x32xf32>
    %341 = arith.subf %325, %340 : vector<8x32xf32>
    %342 = vector.broadcast %339 : vector<8x1xf32> to vector<8x32xf32>
    %343 = arith.mulf %341, %342 : vector<8x32xf32>
    %344 = vector.broadcast %192 : vector<1x32xf32> to vector<8x32xf32>
    %345 = arith.mulf %343, %344 : vector<8x32xf32>
    %346 = vector.broadcast %193 : vector<1x32xf32> to vector<8x32xf32>
    %347 = arith.addf %345, %346 : vector<8x32xf32>
    %348 = arith.truncf %347 : vector<8x32xf32> to vector<8x32xbf16>
    %cst_110 = arith.constant dense<0.000000e+00> : vector<8x128xf32>
    %349 = tpu.matmul %348, %201, %cst_110 {dimension_numbers = #tpu.dot_dimension_numbers<[1], [0], [0], [1], [0, 0, 1, 1], [], []>} : vector<8x32xbf16>, vector<32x128xbf16>, vector<8x128xf32> -> vector<8x128xf32>
    %350 = vector.broadcast %195 : vector<1x128xf32> to vector<8x128xf32>
    %351 = arith.addf %349, %350 : vector<8x128xf32>
    %cst_111 = arith.constant 0.000000e+00 : f32
    %352 = vector.broadcast %cst_111 : f32 to vector<8x128xf32>
    %353 = arith.maximumf %351, %352 : vector<8x128xf32>
    %354 = arith.truncf %353 : vector<8x128xf32> to vector<8x128xbf16>
    %cst_112 = arith.constant dense<0.000000e+00> : vector<8x32xf32>
    %355 = tpu.matmul %354, %203, %cst_112 {dimension_numbers = #tpu.dot_dimension_numbers<[1], [0], [0], [1], [0, 0, 1, 1], [], []>} : vector<8x128xbf16>, vector<128x32xbf16>, vector<8x32xf32> -> vector<8x32xf32>
    %356 = arith.addf %325, %355 : vector<8x32xf32>
    %357 = vector.broadcast %194 : vector<1x32xf32> to vector<8x32xf32>
    %358 = arith.addf %356, %357 : vector<8x32xf32>
    %c14 = arith.constant 14 : index
    %c0_113 = arith.constant 0 : index
    %359 = vector.load %arg5[%c14, %c0_113] : memref<17x128xf32, #tpu.memory_space<vmem>>, vector<1x32xf32>
    %c15 = arith.constant 15 : index
    %c0_114 = arith.constant 0 : index
    %360 = vector.load %arg5[%c15, %c0_114] : memref<17x128xf32, #tpu.memory_space<vmem>>, vector<1x32xf32>
    %c16 = arith.constant 16 : index
    %c0_115 = arith.constant 0 : index
    %361 = vector.load %arg5[%c16, %c0_115] : memref<17x128xf32, #tpu.memory_space<vmem>>, vector<1x128xf32>
    %cst_116 = arith.constant dense<0.000000e+00> : vector<8xf32>
    %362 = vector.multi_reduction <add>, %358, %cst_116 [1] : vector<8x32xf32> to vector<8xf32>
    %363 = vector.shape_cast %362 : vector<8xf32> to vector<8x1xf32>
    %cst_117 = arith.constant 3.200000e+01 : f32
    %364 = vector.broadcast %cst_117 : f32 to vector<8x1xf32>
    %365 = arith.divf %363, %364 : vector<8x1xf32>
    %366 = vector.broadcast %365 : vector<8x1xf32> to vector<8x32xf32>
    %367 = arith.subf %358, %366 : vector<8x32xf32>
    %368 = arith.mulf %367, %367 : vector<8x32xf32>
    %cst_118 = arith.constant dense<0.000000e+00> : vector<8xf32>
    %369 = vector.multi_reduction <add>, %368, %cst_118 [1] : vector<8x32xf32> to vector<8xf32>
    %370 = vector.shape_cast %369 : vector<8xf32> to vector<8x1xf32>
    %cst_119 = arith.constant 3.200000e+01 : f32
    %371 = vector.broadcast %cst_119 : f32 to vector<8x1xf32>
    %372 = arith.divf %370, %371 : vector<8x1xf32>
    %cst_120 = arith.constant 9.99999974E-6 : f32
    %373 = vector.broadcast %cst_120 : f32 to vector<8x1xf32>
    %374 = arith.addf %372, %373 : vector<8x1xf32>
    %375 = math.rsqrt %374 : vector<8x1xf32>
    %376 = vector.broadcast %365 : vector<8x1xf32> to vector<8x32xf32>
    %377 = arith.subf %358, %376 : vector<8x32xf32>
    %378 = vector.broadcast %375 : vector<8x1xf32> to vector<8x32xf32>
    %379 = arith.mulf %377, %378 : vector<8x32xf32>
    %380 = vector.broadcast %359 : vector<1x32xf32> to vector<8x32xf32>
    %381 = arith.mulf %379, %380 : vector<8x32xf32>
    %382 = vector.broadcast %360 : vector<1x32xf32> to vector<8x32xf32>
    %383 = arith.addf %381, %382 : vector<8x32xf32>
    %384 = arith.truncf %383 : vector<8x32xf32> to vector<8x32xbf16>
    %c0_121 = arith.constant 0 : index
    %c0_122 = arith.constant 0 : index
    %385 = vector.load %arg6[%c0_121, %c0_122] : memref<32x128xbf16, #tpu.memory_space<vmem>>, vector<32x128xbf16>
    %cst_123 = arith.constant dense<0.000000e+00> : vector<8x128xf32>
    %386 = tpu.matmul %384, %385, %cst_123 {dimension_numbers = #tpu.dot_dimension_numbers<[1], [0], [0], [1], [0, 0, 1, 1], [], []>} : vector<8x32xbf16>, vector<32x128xbf16>, vector<8x128xf32> -> vector<8x128xf32>
    %387 = vector.broadcast %361 : vector<1x128xf32> to vector<8x128xf32>
    %388 = arith.addf %386, %387 : vector<8x128xf32>
    %c0_124 = arith.constant 0 : index
    %c0_125 = arith.constant 0 : index
    %c0_126 = arith.constant 0 : index
    %389 = vector.load %arg7[%c0_124, %c0_125, %c0_126] : memref<1x8x128xf32, #tpu.memory_space<vmem>>, vector<1x8x128xf32>
    %390 = vector.shape_cast %389 : vector<1x8x128xf32> to vector<8x128xf32>
    %391 = vector.shape_cast %388 : vector<8x128xf32> to vector<1x8x128xf32>
    tpu.vector_store %arg7[%c0_124, %c0_125, %c0_126], %391 {strides = array<i32>} : memref<1x8x128xf32, #tpu.memory_space<vmem>>, vector<1x8x128xf32>,
    return
  }
  func.func @transform_0(%arg0: i32) -> (i32, i32, i32) {
    %c0_i32 = arith.constant 0 : i32
    %c0_i32_0 = arith.constant 0 : i32
    %c0_i32_1 = arith.constant 0 : i32
    return %arg0, %c0_i32, %c0_i32_0 : i32, i32, i32
  }
  func.func @transform_1(%arg0: i32) -> (i32, i32) {
    %c0_i32 = arith.constant 0 : i32
    %c0_i32_0 = arith.constant 0 : i32
    %c0_i32_1 = arith.constant 0 : i32
    return %c0_i32, %c0_i32_0 : i32, i32
  }
  func.func @transform_2(%arg0: i32) -> (i32, i32, i32) {
    %c0_i32 = arith.constant 0 : i32
    %c0_i32_0 = arith.constant 0 : i32
    %c0_i32_1 = arith.constant 0 : i32
    %c0_i32_2 = arith.constant 0 : i32
    return %c0_i32, %c0_i32_0, %c0_i32_1 : i32, i32, i32
  }
  func.func @transform_3(%arg0: i32) -> (i32, i32, i32) {
    %c0_i32 = arith.constant 0 : i32
    %c0_i32_0 = arith.constant 0 : i32
    %c0_i32_1 = arith.constant 0 : i32
    %c0_i32_2 = arith.constant 0 : i32
    return %c0_i32, %c0_i32_0, %c0_i32_1 : i32, i32, i32
  }
  func.func @transform_4(%arg0: i32) -> (i32, i32) {
    %c0_i32 = arith.constant 0 : i32
    %c0_i32_0 = arith.constant 0 : i32
    %c0_i32_1 = arith.constant 0 : i32
    return %c0_i32, %c0_i32_0 : i32, i32
  }
  func.func @transform_5(%arg0: i32) -> (i32, i32) {
    %c0_i32 = arith.constant 0 : i32
    %c0_i32_0 = arith.constant 0 : i32
    %c0_i32_1 = arith.constant 0 : i32
    return %c0_i32, %c0_i32_0 : i32, i32
  }
  func.func @transform_6(%arg0: i32) -> (i32, i32, i32) {
    %c0_i32 = arith.constant 0 : i32
    %c0_i32_0 = arith.constant 0 : i32
    %c0_i32_1 = arith.constant 0 : i32
    return %arg0, %c0_i32, %c0_i32_0 : i32, i32, i32
  }
}

</mosaic_0001>

<bundles_post_ra>
// kernel: forward.1
= control target key start
LH: loop header
LB: loop body
LE: loop exit
PB: predicated region body
PF: predicated region fallthrough
CT: control target
= control target key end

     0   :  { %11 = vsyncpa [#allocation3], 0  ;;  %s3733_s0 = inlined_call_operand.vmem [shape: s32[2,8,1], index: 0, kind: input, shape index: {}]   ;;  %s3734_s1 = inlined_call_operand.vmem [shape: bf16[136,32], index: 1, kind: input, shape index: {}]   ;;  %s3735_s2 = inlined_call_operand.vmem [shape: bf16[2,32,256], index: 2, kind: input, shape index: {}]   ;;  %s3736_s3 = inlined_call_operand.vmem [shape: bf16[2,128,32], index: 3, kind: input, shape index: {}]   ;;  %s3737_s4 = inlined_call_operand.vmem [shape: f32[17,128], index: 4, kind: input, shape index: {}]   ;;  %s3738_s5 = inlined_call_operand.vmem [shape: bf16[32,128], index: 5, kind: input, shape index: {}]   ;;  %s3739_s6 = inlined_call_operand.hbm [shape: f32[2,8,128], index: 6, kind: output, shape index: {}]  }
   0x1   :  { %13 = vsyncpa [#allocation3 + $0x1], 0  ;;  %s3129_s21 = smov 0   ;;  %s3131_s22 = smov 0  }
   0x2   :  { %s3133_s23 = smov 0   ;;  %s3135_s24 = smov 0  }
   0x3 LB: > { %s3150_s25 = sadd.s32 4294967295, %s3074_s24   ;;  %s2412_s26 = sadd.s32 4294967294, %s3074_s24   ;;  %s3074_s24 = sphi %s3135_s24, %s3755_s24   ;;  %s3070_s23 = sphi %s3133_s23, %s3754_s23   ;;  %s3066_s22 = sphi %s3131_s22, %s3753_s22   ;;  %s3062_s21 = sphi %s3129_s21, %s3752_s21  }
   0x4   : > { %s3154_s27 = sadd.s32 1, %s3074_s24   ;;  %s157_s28 = sadd.s32 1, %s3070_s23 }
   0x5   : > { %s154_s29 = ssub.s32 %s3074_s24, %s3154_s27  ;;  %p167_p0 = scmp.ne.s32.totalorder %s3070_s23, %s3066_s22 }
   0x6   : > { %p155_p1 = scmp.eq.s32.totalorder %s154_s29, 0  ;;  %p168_p2 = scmp.eq.s32.totalorder %s3150_s25, 1 }
   0x7   : > { %p173_p3 = scmp.ne.s32.totalorder %s3066_s22, %s3062_s21  ;;  %p174_p4 = scmp.eq.s32.totalorder %s2412_s26, 1 }
   0x8   : > { %s3165_s30 = scalar_select %p155_p1, %s3070_s23, %s157_s28  }
   0x9   : > { %p3167_p5 = por %p168_p2, %p167_p0  ;;  %p3171_p6 = por %p174_p4, %p173_p3 }
   0xa   : > { %p2415_p7 = scmp.ge.s32.totalorder %s3074_s24, 1  ;;  %p214_p8 = scmp.lt.s32.totalorder %s3074_s24, 3 }
   0xc   : > { %p215_p9 = pnand %p2415_p7, %p214_p8 }
   0xd   : > { %p243_p10 = scmp.lt.s32.totalorder (!%p215_p9), %s3150_s25, 1  ;;  %v2928_v0 = vld [vmem:[%s3734_s1] sm:$0xff] (!%p215_p9)   ;;  %v3076_v1 = vmov (!%p215_p9), 0   ;;  %v3077_v2 = vmov (!%p215_p9), 0.0   ;;  %v2929_v3 = vld [vmem:[%s3734_s1 + $0x8] sm:$0xff] (!%p215_p9)   ;;  %v2930_v5 = vld [vmem:[%s3734_s1 + $0x10] sm:$0xff] (!%p215_p9)   ;;  %v249_v11 = vlaneseq (!%p215_p9) }
   0xe   : > { %218 = sbr.rel (%p215_p9) target bundleno = 9298 (0x2452), region = 44  ;;  %2927 = vset.pattern.permute.xlu0 (!%p215_p9), %v3076_v1  ;;  %2627 = vmatprep.subr.bf16.mxu0 (!%p215_p9), %v3077_v2  ;;  %vm3078_vm0 = vmmov (!%p215_p9), 0   ;;  %v2931_v6 = vld [vmem:[%s3734_s1 + $0x18] sm:$0xff] (!%p215_p9)   ;;  %v2932_v7 = vld [vmem:[%s3734_s1 + $0x20] sm:$0xff] (!%p215_p9)   ;;  %v2933_v8 = vld [vmem:[%s3734_s1 + $0x28] sm:$0xff] (!%p215_p9)   ;;  %vm399_vm3 = vcmask (!%p215_p9), 261120  }
   0xf   : > { %2628 = vmatpush3.bf16.msra.mxu0 (!%p215_p9), %v2928_v0  ;;  %2647 = vmatprep.subr.bf16.mxu1 (!%p215_p9), %v3077_v2  ;;  %v2934_v9 = vld [vmem:[%s3734_s1 + $0x30] sm:$0xff] (!%p215_p9)   ;;  %v2935_v10 = vld [vmem:[%s3734_s1 + $0x38] sm:$0xff] (!%p215_p9)   ;;  %v3220_v12 = vand.u32 (!%p215_p9), 127, %v249_v11  ;;  %v3079_v14 = vmov (!%p215_p9), 1.0|1.0   ;;  %vm484_vm4 = vcmask (!%p215_p9), 64512  }
  0x10   : > { %2629 = vmatprep.subr.bf16.mxu0 (!%p215_p9), %v3077_v2  ;;  %2643 = vmatprep.mubr.msk.bf16.mxu0 (!%p215_p9), %vm3078_vm0, %v3077_v2  ;;  %v274_v15 = vld [vmem:[%s3734_s1 + $0x40] sm:$0xf] (!%p215_p9)  ;;  %v3242_v29 = vld [vmem:[%s3735_s2 + $0x8] sm:$0xf] (!%p215_p9)  ;;  %v3247_v30 = vld [vmem:[%s3735_s2 + $0x10] sm:$0xf] (!%p215_p9) }
  0x11   : > { %2651 = vmatprep.mubr.msk.bf16.mxu1 (!%p215_p9), %vm3078_vm0, %v3077_v2  ;;  %v275_v16 = vunpack.c.l.bf16 (!%p215_p9), %v274_v15  ;;  %v3237_v28 = vld [vmem:[%s3735_s2] sm:$0xf] (!%p215_p9)  ;;  %v3254_v32 = vld [vmem:[%s3735_s2 + $0x18] sm:$0xf] (!%p215_p9)  ;;  %v365_v51 = vshrl.u32 (!%p215_p9), %v249_v11, 7  ;;  %s3082_s15 = smov (!%p215_p9), 88  }
  0x12   : > { %v2431_v31 = vcombine.low (!%p215_p9), %v3237_v28, %v3242_v29  ;;  %v2432_v33 = vcombine.low (!%p215_p9), %v3247_v30, %v3254_v32  ;;  %v2429_v38 = vld [vmem:[%s3737_s4] ss:$0 sm:$0xff] (!%p215_p9)  ;;  %v2430_v40 = vld [vmem:[%s3737_s4 + $0x1] ss:$0 sm:$0xff] (!%p215_p9)  ;;  %v3081_v52 = vmov (!%p215_p9), -1e+30  }
  0x13   : > { %2630 = vmatpush3.bf16.msra.mxu0 (!%p215_p9), %v2929_v3  ;;  %vm366_vm5 = vcmp.le.s32.totalorder (!%p215_p9), %v3220_v12, %v365_v51  ;;  %s3083_s16 = smov (!%p215_p9), 64   ;;  %vm548_vm6 = vcmask (!%p215_p9), 1043456   ;;  %s3085_s18 = smov (!%p215_p9), 56  }
  0x14   : > { %2631 = vmatprep.subr.bf16.mxu0 (!%p215_p9), %v3077_v2  ;;  %2648 = vmatpush3.bf16.msra.mxu1 (!%p215_p9), %v2431_v31  ;;  %v3280_v53 = vsel (!%p215_p9), %vm366_vm5, 0.0, %v3081_v52  ;;  %s3086_s19 = smov (!%p215_p9), 80   ;;  %s3744_s20 = smov (!%p215_p9), 112  }
  0x15   : > { %s244_s11 = scalar_select %p243_p10, %s3150_s25, 1  ;;  %2649 = vmatprep.subr.bf16.mxu1 %v3077_v2 }
  0x16   : > { %s3088_s26 = smov 32   ;;  %s3742_s28 = smov 72  }
  0x17   : > { %s2417_s14 = sshll.u32 %s244_s11, 3  ;;  %2632 = vmatpush3.bf16.msra.mxu0 %v2930_v5  ;;  %s3743_s29 = smov 48  }
  0x18   : > { %s246_s17 = scalar_lea.vmem %s3733_s0, %s2417_s14  ;;  %2633 = vmatprep.subr.bf16.mxu0 %v3077_v2  ;;  %2650 = vmatpush3.bf16.msra.mxu1 %v2432_v33  ;;  %s3080_s14 = smov 96   ;;  %v2438_v33 = vcombine.low %v3242_v29, %v3242_v29 }
  0x19   : > { %v248_v4 = vld [vmem:[%s246_s17] sm:$0xff]  ;;  %2655 = vmatprep.subr.bf16.mxu1 %v3077_v2  ;;  %s3084_s17 = smov 120   ;;  %s3741_s9 = smov 104  }
  0x1a   : > { %252 = vperm.xlu0 %2927, %v248_v4   ;;  %s3740_s10 = smov 40   ;;  %s3093_s11 = smov [#allocation2]  }
  0x1b   : > { %2634 = vmatpush3.bf16.msra.mxu0 %v2931_v6  ;;  %s3016_s12 = sshll.u32 %s3093_s11, 4  ;;  %s3017_s12 = int_to_ptr.vmem [resolvable:$false] %s3016_s12 }
  0x1c   : > { %2635 = vmatprep.subr.bf16.mxu0 %v3077_v2 }
  0x1f   : > { %2636 = vmatpush3.bf16.msra.mxu0 %v2932_v7 }
  0x20   : > { %2637 = vmatprep.subr.bf16.mxu0 %v3077_v2 }
  0x23   : > { %2638 = vmatpush3.bf16.msra.mxu0 %v2933_v8 }
  0x24   : > { %2639 = vmatprep.subr.bf16.mxu0 %v3077_v2 }
  0x27   : > { %2640 = vmatpush3.bf16.msra.mxu0 %v2934_v9 }
  0x28   : > { %2641 = vmatprep.subr.bf16.mxu0 %v3077_v2 }
  0x2b   : > { %2642 = vmatpush3.bf16.msra.mxu0 %v2935_v10 }
  0x2c   : > { %2685 = vmatprep.subr.bf16.mxu0 %v3077_v2 }
  0x99   : > { %v253_v13 = vpop.permute.xlu0 %252 }
  0x9a   : > { %vm254_vm1 = vcmp.eq.s32.totalorder %v3220_v12, %v253_v13 }
  0x9b   : > { %vm2427_vm2 = vmpackc.low %vm254_vm1, %vm254_vm1 }
  0x9c   : > { %2644 = vmatmul.mubr.msk.bf16.vlgmr.msra.gmra.mrb[0].mxu0 %vm2427_vm2, %v3079_v14 }
  0x9d   : > { %2687 = vmatprep.mubr.msk.bf16.mxu0 %vm3078_vm0, %v3077_v2 }
 0x16f   : > { %v358_v17 = vpop.f32.mrb[0].mxu0 }
 0x170   : > { %v3228_v18 = vadd.f32 %v358_v17, %v275_v16  ;;  %v2645_v19 = vpop.f32.mrb[1].mxu0 }
 0x171   : > { %v361_v20 = vpop.f32.mrb[2].mxu0 }
 0x172   : > { %v2646_v21 = vpop.f32.mrb[3].mxu0  ;;  %v400_v22 = vsel %vm399_vm3, %v3228_v18, 0.0 }
 0x173   : > { %401 = vadd.xlane.f32.xlu0 %v400_v22 }
 0x200   : > { %v402_v23 = vpop.xlane.xlu0 %401 }
 0x201   : > { %v404_v24 = vmul.f32 0.03125, %v402_v23 }
 0x203   : > { %v405_v25 = vsub.f32 %v3228_v18, %v404_v24 }
 0x205   : > { %v406_v26 = vmul.f32 %v405_v25, %v405_v25 }
 0x207   : > { %v407_v27 = vsel %vm399_vm3, %v406_v26, 0.0 }
 0x208   : > { %408 = vadd.xlane.f32.xlu1 %v407_v27 }
 0x295   : > { %v409_v34 = vpop.xlane.xlu1 %408 }
 0x296   : > { %v410_v35 = vmul.f32 0.03125, %v409_v34 }
 0x298   : > { %v411_v36 = vadd.f32 1e-05, %v410_v35 }
 0x29a   : > { %2970 = vrsqrt.f32 %v411_v36 }
 0x2a4   : > { %v2971_v37 = vpop.eup %2970 }
 0x2a5   : > { %v413_v39 = vmul.f32 %v2971_v37, %v405_v25 }
 0x2a7   : > { %v418_v41 = vmul.f32 %v2429_v38, %v413_v39 }
 0x2a9   : > { %v423_v42 = vadd.f32 %v2430_v40, %v418_v41 }
 0x2ab   : > { %v424_v43 = vpack.c.bf16 %v423_v42, %v423_v42 }
 0x2ad   : > { %2652 = vmatmul.mubr.msk.bf16.vlgmr.msra.gmra.mrb[0].mxu1 %vm399_vm3, %v424_v43 }
 0x2ae   : > { %2657 = vmatprep.mubr.msk.bf16.mxu1 %vm3078_vm0, %v3077_v2 }
 0x380   : > { %v474_v44 = vpop.f32.mrb[0].mxu1 }
 0x381   : > { %v3269_v45 = vpack.c.bf16 %v474_v44, %v474_v44  ;;  %v2653_v46 = vpop.f32.mrb[1].mxu1 }
 0x382   : > { %v477_v47 = vpop.f32.mrb[2].mxu1 }
 0x383   : > { %482 = vrot.lane.b32.xlu1 %v3269_v45, %s3080_s14  ;;  %v2654_v48 = vpop.f32.mrb[3].mxu1 }
 0x3f5   : > { %v483_v49 = vpop.permute.xlu1 %482 }
 0x3f6   : > { %v489_v50 = vsel %vm484_vm4, %v483_v49, 0 }
 0x3f7   : > { %2656 = vmatpush3.bf16.xpose.msra.mxu1 %v489_v50 }
 0x3f8   : > { %2661 = vmatprep.subr.bf16.mxu1 %v3077_v2 }
 0x3fe   : > { %2658 = vmatmul.mubr.msk.bf16.vlgmr.msra.gmra.mrb[4].mxu1 %vm484_vm4, %v3269_v45 }
 0x3ff   : > { %2663 = vmatprep.mubr.msk.bf16.mxu1 %vm3078_vm0, %v3077_v2 }
 0x4d1   : > { %v525_v54 = vpop.f32.mrb[4].mxu1 }
 0x4d2   : > { %v526_v55 = vadd.f32 %v525_v54, %v3280_v53  ;;  %v2659_v56 = vpop.f32.mrb[5].mxu1 }
 0x4d3   : > { %v528_v57 = vpop.f32.mrb[6].mxu1 }
 0x4d4   : > { %v2660_v58 = vpop.f32.mrb[7].mxu1  ;;  %v531_v59 = vsel %vm484_vm4, %v526_v55, -inf }
 0x4d5   : > { %532 = vmax.xlane.f32.xlu1 %v531_v59  ;;  %v2440_v59 = vcombine.low %v3237_v28, %v3237_v28 }
 0x4e6   : > { %595 = vrot.lane.b32.xlu1 %v3269_v45, %s3082_s15 }
 0x562   : > { %v533_v60 = vpop.xlane.xlu1 %532 }
 0x563   : > { %v534_v61 = vsub.f32 %v526_v55, %v533_v60 }
 0x565   : > { %v535_v62 = vmul.f32 1.442695, %v534_v61 }
 0x566   : > { %v596_v7 = vpop.permute.xlu1 %595 }
 0x567   : > { %2972 = vpow2.f32 %v535_v62  ;;  %v601_v9 = vsel %vm484_vm4, %v596_v7, 0 }
 0x571   : > { %v2973_v63 = vpop.eup %2972 }
 0x572   : > { %v537_v0 = vsel %vm484_vm4, %v2973_v63, 0.0 }
 0x573   : > { %538 = vadd.xlane.f32.xlu0 %v537_v0 }
 0x589   : > { %543 = vrot.lane.b32.xlu0 %v3269_v45, %s3083_s16 }
 0x58d   : > { %593 = vrot.lane.b32.xlu0 %v3269_v45, %s3084_s17 }
 0x600   : > { %v539_v1 = vpop.xlane.xlu0 %538 }
 0x601   : > { %2974 = vrcp.f32 %v539_v1 }
 0x604   : > { %v544_v3 = vpop.permute.xlu0 %543 }
 0x605   : > { %v550_v4 = vsel %vm548_vm6, %v544_v3, 0 }
 0x606   : > { %2662 = vmatpush3.bf16.msra.mxu1 %v550_v4 }
 0x607   : > { %2667 = vmatprep.subr.bf16.mxu1 %v3077_v2 }
 0x608   : > { %v594_v10 = vpop.permute.xlu0 %593 }
 0x60b   : > { %v2975_v5 = vpop.eup %2974 }
 0x60c   : > { %v541_v6 = vmul.f32 %v2975_v5, %v2973_v63 }
 0x60e   : > { %v542_v8 = vpack.c.bf16 %v541_v6, %v541_v6 }
 0x610   : > { %2664 = vmatmul.mubr.msk.bf16.vlgmr.msra.gmra.mrb[8].mxu1 %vm484_vm4, %v542_v8 }
 0x611   : > { %2668 = vmatpush3.bf16.xpose.msra.mxu1 %v601_v9  ;;  %2669 = vmatprep.mubr.msk.bf16.mxu1 %vm3078_vm0, %v3077_v2 }
 0x612   : > { %2673 = vmatprep.subr.bf16.mxu1 %v3077_v2 }
 0x618   : > { %2670 = vmatmul.mubr.msk.bf16.vlgmr.msra.gmra.mrb[12].mxu1 %vm484_vm4, %v594_v10 }
 0x619   : > { %2675 = vmatprep.mubr.msk.bf16.mxu1 %vm3078_vm0, %v3077_v2 }
 0x6e3   : > { %v3301_v11 = vpop.f32.mrb[8].mxu1 }
 0x6e4   : > { %v2665_v12 = vpop.f32.mrb[9].mxu1  ;;  %v592_v1 = vpack.c.bf16 %v3301_v11, %v3301_v11 }
 0x6e5   : > { %v589_v13 = vpop.f32.mrb[10].mxu1 }
 0x6e6   : > { %v2666_v14 = vpop.f32.mrb[11].mxu1 }
 0x6eb   : > { %v637_v15 = vpop.f32.mrb[12].mxu1 }
 0x6ec   : > { %v638_v16 = vadd.f32 %v637_v15, %v3280_v53  ;;  %v2671_v17 = vpop.f32.mrb[13].mxu1 }
 0x6ed   : > { %v640_v19 = vpop.f32.mrb[14].mxu1 }
 0x6ee   : > { %v2672_v20 = vpop.f32.mrb[15].mxu1  ;;  %v643_v21 = vsel %vm484_vm4, %v638_v16, -inf }
 0x6ef   : > { %644 = vmax.xlane.f32.xlu0 %v643_v21 }
 0x705   : > { %655 = vrot.lane.b32.xlu0 %v3269_v45, %s3085_s18 }
 0x709   : > { %804 = vrot.lane.b32.xlu0 %v3269_v45, %s3086_s19 }
 0x70d   : > { %802 = vrot.lane.b32.xlu0 %v3269_v45, %s3744_s20 }
 0x77c   : > { %v645_v22 = vpop.xlane.xlu0 %644 }
 0x77d   : > { %v646_v23 = vsub.f32 %v638_v16, %v645_v22 }
 0x77f   : > { %v647_v24 = vmul.f32 1.442695, %v646_v23 }
 0x780   : > { %v656_v25 = vpop.permute.xlu0 %655 }
 0x781   : > { %2976 = vpow2.f32 %v647_v24  ;;  %v661_v26 = vsel %vm548_vm6, %v656_v25, 0 }
 0x782   : > { %2674 = vmatpush3.bf16.msra.mxu1 %v661_v26 }
 0x783   : > { %2679 = vmatprep.subr.bf16.mxu1 %v3077_v2 }
 0x784   : > { %v805_v29 = vpop.permute.xlu0 %804 }
 0x785   : > { %v810_v44 = vsel %vm484_vm4, %v805_v29, 0 }
 0x788   : > { %v803_v47 = vpop.permute.xlu0 %802 }
 0x78b   : > { %v2977_v27 = vpop.eup %2976 }
 0x78c   : > { %v649_v31 = vsel %vm484_vm4, %v2977_v27, 0.0 }
 0x78d   : > { %650 = vadd.xlane.f32.xlu1 %v649_v31 }
 0x79e   : > { %705 = vrot.lane.b32.xlu1 %v2438_v33, %s3088_s26  ;;  %v2444_v33 = vcombine.low %v3247_v30, %v3247_v30 }
 0x81a   : > { %v651_v34 = vpop.xlane.xlu1 %650 }
 0x81b   : > { %2978 = vrcp.f32 %v651_v34 }
 0x81e   : > { %v706_v36 = vpop.permute.xlu1 %705 }
 0x81f   : > { %v711_v39 = vsel %vm548_vm6, %v706_v36, 0 }
 0x825   : > { %v2979_v35 = vpop.eup %2978 }
 0x826   : > { %v653_v37 = vmul.f32 %v2979_v35, %v2977_v27 }
 0x828   : > { %v654_v38 = vpack.c.bf16 %v653_v37, %v653_v37 }
 0x82a   : > { %2676 = vmatmul.mubr.msk.bf16.vlgmr.msra.gmra.mrb[16].mxu1 %vm484_vm4, %v654_v38 }
 0x82b   : > { %2680 = vmatpush3.bf16.msra.mxu1 %v711_v39  ;;  %2681 = vmatprep.mubr.msk.bf16.mxu1 %vm3078_vm0, %v3077_v2 }
 0x82c   : > { %2691 = vmatprep.subr.bf16.mxu1 %v3077_v2 }
 0x8fd   : > { %v697_v40 = vpop.f32.mrb[16].mxu1 }
 0x8fe   : > { %v703_v41 = vpack.c.bf16 %v697_v40, %v697_v40  ;;  %v2677_v42 = vpop.f32.mrb[17].mxu1  ;;  %v2448_v40 = vcombine.low %v3254_v32, %v3254_v32 }
 0x8ff   : > { %v700_v43 = vpop.f32.mrb[18].mxu1 }
 0x900   : > { %v2678_v46 = vpop.f32.mrb[19].mxu1  ;;  %2682 = vmatmul.mubr.msk.bf16.vlgmr.msra.gmra.mrb[20].mxu1 %vm484_vm4, %v703_v41 }
 0x901   : > { %2692 = vmatpush3.bf16.xpose.msra.mxu1 %v810_v44  ;;  %2693 = vmatprep.mubr.msk.bf16.mxu1 %vm3078_vm0, %v3077_v2 }
 0x902   : > { %2703 = vmatprep.subr.bf16.mxu1 %v3077_v2 }
 0x908   : > { %2694 = vmatmul.mubr.msk.bf16.vlgmr.msra.gmra.mrb[24].mxu1 %vm484_vm4, %v803_v47 }
 0x909   : > { %2705 = vmatprep.mubr.msk.bf16.mxu1 %vm3078_vm0, %v3077_v2 }
 0x9d3   : > { %v747_v48 = vpop.f32.mrb[20].mxu1 }
 0x9d4   : > { %v2683_v49 = vpop.f32.mrb[21].mxu1 }
 0x9d5   : > { %v750_v50 = vpop.f32.mrb[22].mxu1 }
 0x9d6   : > { %v2684_v51 = vpop.f32.mrb[23].mxu1 }
 0x9db   : > { %v846_v52 = vpop.f32.mrb[24].mxu1 }
 0x9dc   : > { %v847_v54 = vadd.f32 %v846_v52, %v3280_v53  ;;  %v2695_v55 = vpop.f32.mrb[25].mxu1 }
 0x9dd   : > { %v849_v56 = vpop.f32.mrb[26].mxu1 }
 0x9de   : > { %v2696_v57 = vpop.f32.mrb[27].mxu1  ;;  %v852_v58 = vsel %vm484_vm4, %v847_v54, -inf }
 0x9df   : > { %853 = vmax.xlane.f32.xlu0 %v852_v58 }
 0x9f5   : > { %754 = vrot.lane.b32.xlu0 %v2440_v59, %s3088_s26 }
 0x9f9   : > { %965 = vrot.lane.b32.xlu0 %v3269_v45, %s3742_s28  ;;  %s3018_s28 = scalar_lea.vmem %s3017_s12, 256 }
 0xa6c   : > { %v854_v60 = vpop.xlane.xlu0 %853 }
 0xa6d   : > { %v855_v61 = vsub.f32 %v847_v54, %v854_v60 }
 0xa6f   : > { %v856_v62 = vmul.f32 1.442695, %v855_v61 }
 0xa70   : > { %v755_v63 = vpop.permute.xlu0 %754 }
 0xa71   : > { %2980 = vpow2.f32 %v856_v62  ;;  %v760_v0 = vsel %vm548_vm6, %v755_v63, 0  ;;  %v2450_v62 = vld [vmem:[%s3737_s4 + $0x2] ss:$0 sm:$0xff] }
 0xa72   : > { %2686 = vmatpush3.bf16.msra.mxu0 %v760_v0 }
 0xa73   : > { %2697 = vmatprep.subr.bf16.mxu0 %v3077_v2 }
 0xa74   : > { %v966_v9 = vpop.permute.xlu0 %965 }
 0xa75   : > { %2688 = vmatmul.mubr.msk.bf16.vlgmr.msra.gmra.mrb[4].mxu0 %vm484_vm4, %v592_v1  ;;  %v971_v11 = vsel %vm484_vm4, %v966_v9, 0  ;;  %v2942_v9 = vld [vmem:[%s3735_s2 + $0x4] ss:$8 sps:$4 sm:$0xff]  }
 0xa76   : > { %2699 = vmatprep.mubr.msk.bf16.mxu0 %vm3078_vm0, %v3077_v2 }
 0xa7b   : > { %v2981_v28 = vpop.eup %2980 }
 0xa7c   : > { %v858_v3 = vsel %vm484_vm4, %v2981_v28, 0.0 }
 0xa7d   : > { %859 = vadd.xlane.f32.xlu1 %v858_v3 }
 0xa8e   : > { %864 = vrot.lane.b32.xlu1 %v3269_v45, %s3743_s29  ;;  %s240_s29 = sand.u32 1, %s3066_s22  }
 0xa92   : > { %963 = vrot.lane.b32.xlu1 %v3269_v45, %s3741_s9  ;;  %s2416_s9 = sshll.u32 %s240_s29, 3 }
 0xb0a   : > { %v860_v4 = vpop.xlane.xlu1 %859 }
 0xb0b   : > { %2982 = vrcp.f32 %v860_v4 }
 0xb0e   : > { %v865_v5 = vpop.permute.xlu1 %864 }
 0xb0f   : > { %v870_v6 = vsel %vm548_vm6, %v865_v5, 0 }
 0xb10   : > { %2698 = vmatpush3.bf16.msra.mxu0 %v870_v6 }
 0xb11   : > { %2709 = vmatprep.subr.bf16.mxu0 %v3077_v2 }
 0xb12   : > { %v964_v12 = vpop.permute.xlu1 %963 }
 0xb15   : > { %v2983_v7 = vpop.eup %2982 }
 0xb16   : > { %v862_v8 = vmul.f32 %v2983_v7, %v2981_v28 }
 0xb18   : > { %v863_v10 = vpack.c.bf16 %v862_v8, %v862_v8 }
 0xb1a   : > { %2700 = vmatmul.mubr.msk.bf16.vlgmr.msra.gmra.mrb[8].mxu0 %vm484_vm4, %v863_v10  ;;  %v2944_v10 = vld [vmem:[%s3736_s3] sm:$0xff]  }
 0xb1b   : > { %2710 = vmatpush3.bf16.xpose.msra.mxu0 %v971_v11  ;;  %2711 = vmatprep.mubr.msk.bf16.mxu0 %vm3078_vm0, %v3077_v2  ;;  %v2945_v11 = vld [vmem:[%s3736_s3 + $0x8] sm:$0xff]  }
 0xb1c   : > { %2721 = vmatprep.subr.bf16.mxu0 %v3077_v2 }
 0xb22   : > { %2712 = vmatmul.mubr.msk.bf16.vlgmr.msra.gmra.mrb[12].mxu0 %vm484_vm4, %v964_v12  ;;  %v2946_v12 = vld [vmem:[%s3736_s3 + $0x10] sm:$0xff]  }
 0xb23   : > { %2723 = vmatprep.mubr.msk.bf16.mxu0 %vm3078_vm0, %v3077_v2 }
 0xb48   : > { %v796_v13 = vpop.f32.mrb[4].mxu0 }
 0xb49   : > { %v797_v14 = vadd.f32 %v796_v13, %v747_v48  ;;  %v2689_v15 = vpop.f32.mrb[5].mxu0  ;;  %v2947_v13 = vld [vmem:[%s3736_s3 + $0x18] sm:$0xff]  }
 0xb4a   : > { %v799_v16 = vpop.f32.mrb[6].mxu0  ;;  %v2949_v15 = vld [vmem:[%s3736_s3 + $0x28] sm:$0xff]  }
 0xb4b   : > { %v2690_v17 = vpop.f32.mrb[7].mxu0 }
 0xbed   : > { %v906_v19 = vpop.f32.mrb[8].mxu0 }
 0xbee   : > { %v2701_v20 = vpop.f32.mrb[9].mxu0  ;;  %v912_v39 = vpack.c.bf16 %v906_v19, %v906_v19 }
 0xbef   : > { %v909_v21 = vpop.f32.mrb[10].mxu0 }
 0xbf0   : > { %v2702_v22 = vpop.f32.mrb[11].mxu0  ;;  %v2451_v21 = vld [vmem:[%s3737_s4 + $0x3] ss:$0 sm:$0xff] }
 0xbf5   : > { %v1007_v23 = vpop.f32.mrb[12].mxu0 }
 0xbf6   : > { %v1008_v24 = vadd.f32 %v1007_v23, %v3280_v53  ;;  %v2713_v25 = vpop.f32.mrb[13].mxu0  ;;  %v2452_v23 = vld [vmem:[%s3737_s4 + $0x4] ss:$0 sm:$0xff] }
 0xbf7   : > { %v1010_v26 = vpop.f32.mrb[14].mxu0 }
 0xbf8   : > { %v2714_v27 = vpop.f32.mrb[15].mxu0  ;;  %v1013_v31 = vsel %vm484_vm4, %v1008_v24, -inf }
 0xbf9   : > { %1014 = vmax.xlane.f32.xlu0 %v1013_v31  ;;  %v2950_v27 = vld [vmem:[%s3736_s3 + $0x30] sm:$0xff]   ;;  %v2951_v31 = vld [vmem:[%s3736_s3 + $0x38] sm:$0xff]  }
 0xc0f   : > { %914 = vrot.lane.b32.xlu0 %v2444_v33, %s3088_s26  ;;  %v2453_v33 = vld [vmem:[%s3737_s4 + $0x6] ss:$0 sm:$0xff] }
 0xc13   : > { %1075 = vrot.lane.b32.xlu0 %v2448_v40, %s3088_s26 }
 0xc86   : > { %v1015_v34 = vpop.xlane.xlu0 %1014 }
 0xc87   : > { %v1016_v35 = vsub.f32 %v1008_v24, %v1015_v34 }
 0xc89   : > { %v1017_v36 = vmul.f32 1.442695, %v1016_v35 }
 0xc8a   : > { %v915_v37 = vpop.permute.xlu0 %914 }
 0xc8b   : > { %2984 = vpow2.f32 %v1017_v36  ;;  %v920_v38 = vsel %vm548_vm6, %v915_v37, 0 }
 0xc8c   : > { %2704 = vmatpush3.bf16.msra.mxu1 %v920_v38 }
 0xc8d   : > { %2715 = vmatprep.subr.bf16.mxu1 %v3077_v2 }
 0xc8f   : > { %2706 = vmatmul.mubr.msk.bf16.vlgmr.msra.gmra.mrb[28].mxu1 %vm484_vm4, %v912_v39 }
 0xc90   : > { %2717 = vmatprep.mubr.msk.bf16.mxu1 %vm3078_vm0, %v3077_v2 }
 0xc95   : > { %v2985_v29 = vpop.eup %2984 }
 0xc96   : > { %v1019_v30 = vsel %vm484_vm4, %v2985_v29, 0.0 }
 0xc97   : > { %1020 = vadd.xlane.f32.xlu1 %v1019_v30  ;;  %v2465_v30 = vld [vmem:[%s3737_s4 + $0x5] ss:$0 sm:$0xff] }
 0xca8   : > { %1025 = vrot.lane.b32.xlu1 %v3269_v45, %s3740_s10  ;;  %v1076_v45 = vpop.permute.xlu0 %1075  ;;  %s2340_s10 = scalar_lea.sflag [#allocation3], %s240_s29 }
 0xca9   : > { %v1081_v32 = vsel %vm548_vm6, %v1076_v45, 0 }
 0xcaa   : > { %2722 = vmatpush3.bf16.msra.mxu0 %v1081_v32 }
 0xcab   : > { %2735 = vmatprep.subr.bf16.mxu0 %v3077_v2 }
 0xd24   : > { %v1021_v41 = vpop.xlane.xlu1 %1020 }
 0xd25   : > { %2986 = vrcp.f32 %v1021_v41 }
 0xd28   : > { %v1026_v42 = vpop.permute.xlu1 %1025 }
 0xd29   : > { %v1031_v43 = vsel %vm548_vm6, %v1026_v42, 0 }
 0xd2a   : > { %2716 = vmatpush3.bf16.msra.mxu1 %v1031_v43 }
 0xd2b   : > { %2727 = vmatprep.subr.bf16.mxu1 %v3077_v2 }
 0xd2f   : > { %v2987_v44 = vpop.eup %2986 }
 0xd30   : > { %v1023_v46 = vmul.f32 %v2987_v44, %v2985_v29 }
 0xd32   : > { %v1024_v47 = vpack.c.bf16 %v1023_v46, %v1023_v46 }
 0xd34   : > { %2718 = vmatmul.mubr.msk.bf16.vlgmr.msra.gmra.mrb[32].mxu1 %vm484_vm4, %v1024_v47 }
 0xd35   : > { %2731 = vmatprep.mubr.msk.bf16.mxu1 %vm3078_vm0, %v3077_v2  ;;  %2728 = vmatpush3.bf16.msra.mxu1 %v2942_v9 }
 0xd36   : > { %2729 = vmatprep.subr.bf16.mxu1 %v3077_v2 }
 0xd62   : > { %v956_v48 = vpop.f32.mrb[28].mxu1 }
 0xd63   : > { %v962_v49 = vadd.f32 %v956_v48, %v797_v14  ;;  %v2707_v50 = vpop.f32.mrb[29].mxu1  ;;  %v2948_v14 = vld [vmem:[%s3736_s3 + $0x20] sm:$0xff]  }
 0xd64   : > { %v959_v51 = vpop.f32.mrb[30].mxu1 }
 0xd65   : > { %v2708_v52 = vpop.f32.mrb[31].mxu1  ;;  %v3462_v51 = vld [vmem:[%s3735_s2 + $0x20] sm:$0xf] }
 0xd66   : > { %v3467_v52 = vld [vmem:[%s3735_s2 + $0x28] sm:$0xf] }
 0xe07   : > { %v1067_v54 = vpop.f32.mrb[32].mxu1 }
 0xe08   : > { %v1073_v55 = vpack.c.bf16 %v1067_v54, %v1067_v54  ;;  %v2719_v56 = vpop.f32.mrb[33].mxu1  ;;  %v2492_v54 = vcombine.low %v3462_v51, %v3467_v52 }
 0xe09   : > { %v1070_v57 = vpop.f32.mrb[34].mxu1  ;;  %v3479_v56 = vld [vmem:[%s3735_s2 + $0x38] sm:$0xf] }
 0xe0a   : > { %v2720_v58 = vpop.f32.mrb[35].mxu1  ;;  %2724 = vmatmul.mubr.msk.bf16.vlgmr.msra.gmra.mrb[16].mxu0 %vm484_vm4, %v1073_v55  ;;  %v3474_v55 = vld [vmem:[%s3735_s2 + $0x30] sm:$0xf] }
 0xe0b   : > { %2751 = vmatprep.mubr.msk.bf16.mxu0 %vm3078_vm0, %v3077_v2  ;;  %2736 = vmatpush3.bf16.msra.mxu0 %v2944_v10  ;;  %v2493_v57 = vcombine.low %v3474_v55, %v3479_v56 }
 0xe0c   : > { %2737 = vmatprep.subr.bf16.mxu0 %v3077_v2 }
 0xe0f   : > { %2738 = vmatpush3.bf16.msra.mxu0 %v2945_v11 }
 0xe10   : > { %2739 = vmatprep.subr.bf16.mxu0 %v3077_v2 }
 0xe13   : > { %2740 = vmatpush3.bf16.msra.mxu0 %v2946_v12 }
 0xe14   : > { %2741 = vmatprep.subr.bf16.mxu0 %v3077_v2 }
 0xe17   : > { %2742 = vmatpush3.bf16.msra.mxu0 %v2947_v13 }
 0xe18   : > { %2743 = vmatprep.subr.bf16.mxu0 %v3077_v2 }
 0xe1b   : > { %2744 = vmatpush3.bf16.msra.mxu0 %v2948_v14 }
 0xe1c   : > { %2745 = vmatprep.subr.bf16.mxu0 %v3077_v2 }
 0xe1f   : > { %2746 = vmatpush3.bf16.msra.mxu0 %v2949_v15 }
 0xe20   : > { %2747 = vmatprep.subr.bf16.mxu0 %v3077_v2 }
 0xe23   : > { %2748 = vmatpush3.bf16.msra.mxu0 %v2950_v27 }
 0xe24   : > { %2749 = vmatprep.subr.bf16.mxu0 %v3077_v2 }
 0xe27   : > { %2750 = vmatpush3.bf16.msra.mxu0 %v2951_v31 }
 0xe28   : > { %2781 = vmatprep.subr.bf16.mxu0 %v3077_v2 }
 0xedd   : > { %v1117_v59 = vpop.f32.mrb[16].mxu0 }
 0xede   : > { %v1123_v60 = vadd.f32 %v1117_v59, %v962_v49  ;;  %v2725_v61 = vpop.f32.mrb[17].mxu0 }
 0xedf   : > { %v1120_v63 = vpop.f32.mrb[18].mxu0 }
 0xee0   : > { %v1124_v0 = vadd.f32 %v1123_v60, %v3228_v18  ;;  %v2726_v1 = vpop.f32.mrb[19].mxu0  ;;  %v2943_v18 = vld [vmem:[%s3735_s2 + $0x14] ss:$8 sps:$4 sm:$0xff]  }
 0xee1   : > { %2730 = vmatpush3.bf16.msra.mxu1 %v2943_v18 }
 0xee2   : > { %v3389_v28 = vadd.f32 %v2450_v62, %v1124_v0  ;;  %2755 = vmatprep.subr.bf16.mxu1 %v3077_v2  ;;  %v2490_v62 = vld [vmem:[%s3737_s4 + $0x7] ss:$0 sm:$0xff]  ;;  %v2491_v0 = vld [vmem:[%s3737_s4 + $0x8] ss:$0 sm:$0xff] }
 0xee4   : > { %v1130_v3 = vsel %vm399_vm3, %v3389_v28, 0.0 }
 0xee5   : > { %1131 = vadd.xlane.f32.xlu1 %v1130_v3 }
 0xf72   : > { %v1132_v4 = vpop.xlane.xlu1 %1131 }
 0xf73   : > { %v1133_v5 = vmul.f32 0.03125, %v1132_v4 }
 0xf75   : > { %v1134_v6 = vsub.f32 %v3389_v28, %v1133_v5 }
 0xf77   : > { %v1135_v7 = vmul.f32 %v1134_v6, %v1134_v6 }
 0xf79   : > { %v1136_v8 = vsel %vm399_vm3, %v1135_v7, 0.0 }
 0xf7a   : > { %1137 = vadd.xlane.f32.xlu0 %v1136_v8 }
0x1007   : > { %v1138_v16 = vpop.xlane.xlu0 %1137 }
0x1008   : > { %v1139_v17 = vmul.f32 0.03125, %v1138_v16 }
0x100a   : > { %v1140_v19 = vadd.f32 1e-05, %v1139_v17 }
0x100c   : > { %2988 = vrsqrt.f32 %v1140_v19 }
0x1016   : > { %v2989_v20 = vpop.eup %2988 }
0x1017   : > { %v1142_v22 = vmul.f32 %v2989_v20, %v1134_v6 }
0x1019   : > { %v1147_v24 = vmul.f32 %v2451_v21, %v1142_v22 }
0x101b   : > { %v1152_v25 = vadd.f32 %v2452_v23, %v1147_v24 }
0x101d   : > { %v1153_v26 = vpack.c.bf16 %v1152_v25, %v1152_v25 }
0x101f   : > { %2732 = vmatmul.mubr.msk.bf16.vlgmr.msra.gmra.mrb[36].mxu1 %vm399_vm3, %v1153_v26 }
0x1020   : > { %2759 = vmatprep.mubr.msk.bf16.mxu1 %vm3078_vm0, %v3077_v2  ;;  %2756 = vmatpush3.bf16.msra.mxu1 %v2492_v54 }
0x1021   : > { %2757 = vmatprep.subr.bf16.mxu1 %v3077_v2 }
0x1024   : > { %2758 = vmatpush3.bf16.msra.mxu1 %v2493_v57 }
0x1025   : > { %2763 = vmatprep.subr.bf16.mxu1 %v3077_v2 }
0x10f2   : > { %v1207_v34 = vpop.f32.mrb[36].mxu1 }
0x10f3   : > { %v1208_v35 = vadd.f32 %v2453_v33, %v1207_v34  ;;  %v2733_v36 = vpop.f32.mrb[37].mxu1 }
0x10f4   : > { %v1210_v37 = vpop.f32.mrb[38].mxu1 }
0x10f5   : > { %v1213_v38 = vmax.f32 %v1208_v35, 0.0  ;;  %v2734_v39 = vpop.f32.mrb[39].mxu1 }
0x10f7   : > { %v1214_v29 = vpack.c.bf16 %v1213_v38, %v1213_v38 }
0x10f9   : > { %2752 = vmatmul.mubr.bf16.vlgmr.msra.gmra.mrb[20].mxu0 %v1214_v29 }
0x10fa   : > { %2783 = vmatprep.mubr.msk.bf16.mxu0 %vm3078_vm0, %v3077_v2 }
0x11cc   : > { %v1297_v40 = vpop.f32.mrb[20].mxu0 }
0x11cd   : > { %v1303_v41 = vadd.f32 %v1297_v40, %v3389_v28  ;;  %v2753_v42 = vpop.f32.mrb[21].mxu0 }
0x11ce   : > { %v1300_v43 = vpop.f32.mrb[22].mxu0 }
0x11cf   : > { %v3453_v44 = vadd.f32 %v2465_v30, %v1303_v41  ;;  %v2754_v46 = vpop.f32.mrb[23].mxu0  ;;  %v2499_v43 = vcombine.low %v3467_v52, %v3467_v52 }
0x11d1   : > { %v1342_v47 = vsel %vm399_vm3, %v3453_v44, 0.0 }
0x11d2   : > { %1343 = vadd.xlane.f32.xlu0 %v1342_v47 }
0x125f   : > { %v1344_v45 = vpop.xlane.xlu0 %1343 }
0x1260   : > { %v1345_v32 = vmul.f32 0.03125, %v1344_v45 }
0x1262   : > { %v1346_v48 = vsub.f32 %v3453_v44, %v1345_v32 }
0x1264   : > { %v1347_v49 = vmul.f32 %v1346_v48, %v1346_v48 }
0x1266   : > { %v1348_v50 = vsel %vm399_vm3, %v1347_v49, 0.0 }
0x1267   : > { %1349 = vadd.xlane.f32.xlu1 %v1348_v50 }
0x12f4   : > { %v1350_v58 = vpop.xlane.xlu1 %1349 }
0x12f5   : > { %v1351_v59 = vmul.f32 0.03125, %v1350_v58 }
0x12f7   : > { %v1352_v60 = vadd.f32 1e-05, %v1351_v59 }
0x12f9   : > { %2990 = vrsqrt.f32 %v1352_v60 }
0x1303   : > { %v2991_v61 = vpop.eup %2990 }
0x1304   : > { %v1354_v63 = vmul.f32 %v2991_v61, %v1346_v48 }
0x1306   : > { %v1359_v1 = vmul.f32 %v2490_v62, %v1354_v63 }
0x1308   : > { %v1364_v28 = vadd.f32 %v2491_v0, %v1359_v1 }
0x130a   : > { %v1365_v3 = vpack.c.bf16 %v1364_v28, %v1364_v28 }
0x130c   : > { %2760 = vmatmul.mubr.msk.bf16.vlgmr.msra.gmra.mrb[40].mxu1 %vm399_vm3, %v1365_v3 }
0x130d   : > { %2765 = vmatprep.mubr.msk.bf16.mxu1 %vm3078_vm0, %v3077_v2 }
0x13df   : > { %v1415_v4 = vpop.f32.mrb[40].mxu1 }
0x13e0   : > { %v3494_v5 = vpack.c.bf16 %v1415_v4, %v1415_v4  ;;  %v2761_v6 = vpop.f32.mrb[41].mxu1 }
0x13e1   : > { %v1418_v7 = vpop.f32.mrb[42].mxu1 }
0x13e2   : > { %1423 = vrot.lane.b32.xlu0 %v3494_v5, %s3080_s14  ;;  %v2762_v8 = vpop.f32.mrb[43].mxu1  ;;  %s3747_s14 = smov 112  }
0x13e6   : > { %1534 = vrot.lane.b32.xlu0 %v3494_v5, %s3082_s15  ;;  %s3748_s15 = smov 48  }
0x13ea   : > { %1532 = vrot.lane.b32.xlu0 %v3494_v5, %s3084_s17  ;;  %s3750_s17 = smov 104  }
0x1454   : > { %v1424_v9 = vpop.permute.xlu0 %1423 }
0x1455   : > { %v1429_v18 = vsel %vm484_vm4, %v1424_v9, 0 }
0x1456   : > { %2764 = vmatpush3.bf16.xpose.msra.mxu1 %v1429_v18 }
0x1457   : > { %2769 = vmatprep.subr.bf16.mxu1 %v3077_v2 }
0x1458   : > { %v1535_v27 = vpop.permute.xlu0 %1534 }
0x1459   : > { %v1540_v33 = vsel %vm484_vm4, %v1535_v27, 0 }
0x145c   : > { %v1533_v34 = vpop.permute.xlu0 %1532 }
0x145d   : > { %2766 = vmatmul.mubr.msk.bf16.vlgmr.msra.gmra.mrb[44].mxu1 %vm484_vm4, %v3494_v5 }
0x145e   : > { %2771 = vmatprep.mubr.msk.bf16.mxu1 %vm3078_vm0, %v3077_v2 }
0x1530   : > { %v1465_v10 = vpop.f32.mrb[44].mxu1 }
0x1531   : > { %v1466_v11 = vadd.f32 %v1465_v10, %v3280_v53  ;;  %v2767_v12 = vpop.f32.mrb[45].mxu1 }
0x1532   : > { %v1468_v13 = vpop.f32.mrb[46].mxu1 }
0x1533   : > { %v2768_v14 = vpop.f32.mrb[47].mxu1  ;;  %v1471_v15 = vsel %vm484_vm4, %v1466_v11, -inf }
0x1534   : > { %1472 = vmax.xlane.f32.xlu1 %v1471_v15 }
0x15c1   : > { %v1473_v16 = vpop.xlane.xlu1 %1472 }
0x15c2   : > { %v1474_v17 = vsub.f32 %v1466_v11, %v1473_v16 }
0x15c4   : > { %v1475_v19 = vmul.f32 1.442695, %v1474_v17 }
0x15c6   : > { %2992 = vpow2.f32 %v1475_v19 }
0x15d0   : > { %v2993_v20 = vpop.eup %2992 }
0x15d1   : > { %v1477_v21 = vsel %vm484_vm4, %v2993_v20, 0.0 }
0x15d2   : > { %1478 = vadd.xlane.f32.xlu1 %v1477_v21  ;;  %v2501_v21 = vcombine.low %v3462_v51, %v3462_v51 }
0x15e3   : > { %1483 = vrot.lane.b32.xlu1 %v3494_v5, %s3083_s16  ;;  %s3749_s16 = smov 72  }
0x165f   : > { %v1479_v22 = vpop.xlane.xlu1 %1478 }
0x1660   : > { %2994 = vrcp.f32 %v1479_v22 }
0x1663   : > { %v1484_v23 = vpop.permute.xlu1 %1483 }
0x1664   : > { %v1489_v24 = vsel %vm548_vm6, %v1484_v23, 0 }
0x1665   : > { %2770 = vmatpush3.bf16.msra.mxu1 %v1489_v24 }
0x1666   : > { %2775 = vmatprep.subr.bf16.mxu1 %v3077_v2 }
0x166a   : > { %v2995_v25 = vpop.eup %2994 }
0x166b   : > { %v1481_v26 = vmul.f32 %v2995_v25, %v2993_v20 }
0x166d   : > { %v1482_v31 = vpack.c.bf16 %v1481_v26, %v1481_v26 }
0x166f   : > { %2772 = vmatmul.mubr.msk.bf16.vlgmr.msra.gmra.mrb[48].mxu1 %vm484_vm4, %v1482_v31 }
0x1670   : > { %2776 = vmatpush3.bf16.xpose.msra.mxu1 %v1540_v33  ;;  %2777 = vmatprep.mubr.msk.bf16.mxu1 %vm3078_vm0, %v3077_v2 }
0x1671   : > { %2787 = vmatprep.subr.bf16.mxu1 %v3077_v2 }
0x1677   : > { %2778 = vmatmul.mubr.msk.bf16.vlgmr.msra.gmra.mrb[52].mxu1 %vm484_vm4, %v1533_v34 }
0x1678   : > { %2789 = vmatprep.mubr.msk.bf16.mxu1 %vm3078_vm0, %v3077_v2 }
0x1742   : > { %v3523_v35 = vpop.f32.mrb[48].mxu1 }
0x1743   : > { %v2773_v36 = vpop.f32.mrb[49].mxu1  ;;  %v1531_v26 = vpack.c.bf16 %v3523_v35, %v3523_v35 }
0x1744   : > { %v1528_v37 = vpop.f32.mrb[50].mxu1 }
0x1745   : > { %v2774_v38 = vpop.f32.mrb[51].mxu1 }
0x174a   : > { %v1576_v39 = vpop.f32.mrb[52].mxu1 }
0x174b   : > { %v1577_v29 = vadd.f32 %v1576_v39, %v3280_v53  ;;  %v2779_v30 = vpop.f32.mrb[53].mxu1 }
0x174c   : > { %v1579_v40 = vpop.f32.mrb[54].mxu1 }
0x174d   : > { %v2780_v41 = vpop.f32.mrb[55].mxu1  ;;  %v1582_v42 = vsel %vm484_vm4, %v1577_v29, -inf }
0x174e   : > { %1583 = vmax.xlane.f32.xlu1 %v1582_v42 }
0x175f   : > { %1644 = vrot.lane.b32.xlu1 %v2499_v43, %s3088_s26 }
0x1763   : > { %1743 = vrot.lane.b32.xlu1 %v3494_v5, %s3086_s19 }
0x17db   : > { %v1584_v46 = vpop.xlane.xlu1 %1583 }
0x17dc   : > { %v1585_v47 = vsub.f32 %v1577_v29, %v1584_v46 }
0x17de   : > { %v1586_v45 = vmul.f32 1.442695, %v1585_v47 }
0x17df   : > { %v1645_v32 = vpop.permute.xlu1 %1644 }
0x17e0   : > { %2996 = vpow2.f32 %v1586_v45  ;;  %v1650_v48 = vsel %vm548_vm6, %v1645_v32, 0 }
0x17e1   : > { %2788 = vmatpush3.bf16.msra.mxu1 %v1650_v48 }
0x17e2   : > { %2799 = vmatprep.subr.bf16.mxu1 %v3077_v2 }
0x17e3   : > { %v1744_v61 = vpop.permute.xlu1 %1743 }
0x17e4   : > { %v1749_v28 = vsel %vm484_vm4, %v1744_v61, 0 }
0x17ea   : > { %v2997_v49 = vpop.eup %2996 }
0x17eb   : > { %v1588_v50 = vsel %vm484_vm4, %v2997_v49, 0.0 }
0x17ec   : > { %1589 = vadd.xlane.f32.xlu0 %v1588_v50 }
0x1802   : > { %1594 = vrot.lane.b32.xlu0 %v3494_v5, %s3085_s18  ;;  %s3751_s18 = smov 40  }
0x1806   : > { %1741 = vrot.lane.b32.xlu0 %v3494_v5, %s3747_s14 }
0x1879   : > { %v1590_v52 = vpop.xlane.xlu0 %1589 }
0x187a   : > { %2998 = vrcp.f32 %v1590_v52 }
0x187d   : > { %v1595_v54 = vpop.permute.xlu0 %1594 }
0x187e   : > { %v1600_v57 = vsel %vm548_vm6, %v1595_v54, 0 }
0x187f   : > { %2782 = vmatpush3.bf16.msra.mxu0 %v1600_v57 }
0x1880   : > { %2793 = vmatprep.subr.bf16.mxu0 %v3077_v2 }
0x1881   : > { %v1742_v4 = vpop.permute.xlu0 %1741 }
0x1884   : > { %v2999_v58 = vpop.eup %2998 }
0x1885   : > { %v1592_v59 = vmul.f32 %v2999_v58, %v2997_v49 }
0x1887   : > { %v1593_v60 = vpack.c.bf16 %v1592_v59, %v1592_v59  ;;  %v2509_v59 = vcombine.low %v3479_v56, %v3479_v56 }
0x1889   : > { %2784 = vmatmul.mubr.msk.bf16.vlgmr.msra.gmra.mrb[24].mxu0 %vm484_vm4, %v1593_v60 }
0x188a   : > { %2795 = vmatprep.mubr.msk.bf16.mxu0 %vm3078_vm0, %v3077_v2 }
0x195c   : > { %v1636_v62 = vpop.f32.mrb[24].mxu0 }
0x195d   : > { %v1642_v63 = vpack.c.bf16 %v1636_v62, %v1636_v62  ;;  %v2785_v0 = vpop.f32.mrb[25].mxu0 }
0x195e   : > { %v1639_v1 = vpop.f32.mrb[26].mxu0 }
0x195f   : > { %v2786_v3 = vpop.f32.mrb[27].mxu0  ;;  %2790 = vmatmul.mubr.msk.bf16.vlgmr.msra.gmra.mrb[56].mxu1 %vm484_vm4, %v1642_v63 }
0x1960   : > { %2800 = vmatpush3.bf16.xpose.msra.mxu1 %v1749_v28  ;;  %2801 = vmatprep.mubr.msk.bf16.mxu1 %vm3078_vm0, %v3077_v2 }
0x1961   : > { %2811 = vmatprep.subr.bf16.mxu1 %v3077_v2 }
0x1967   : > { %2802 = vmatmul.mubr.msk.bf16.vlgmr.msra.gmra.mrb[60].mxu1 %vm484_vm4, %v1742_v4 }
0x1968   : > { %2813 = vmatprep.mubr.msk.bf16.mxu1 %vm3078_vm0, %v3077_v2 }
0x1a32   : > { %v1686_v6 = vpop.f32.mrb[56].mxu1 }
0x1a33   : > { %v2791_v7 = vpop.f32.mrb[57].mxu1 }
0x1a34   : > { %v1689_v8 = vpop.f32.mrb[58].mxu1 }
0x1a35   : > { %v2792_v9 = vpop.f32.mrb[59].mxu1 }
0x1a3a   : > { %v1785_v18 = vpop.f32.mrb[60].mxu1 }
0x1a3b   : > { %v1786_v10 = vadd.f32 %v1785_v18, %v3280_v53  ;;  %v2803_v11 = vpop.f32.mrb[61].mxu1 }
0x1a3c   : > { %v1788_v12 = vpop.f32.mrb[62].mxu1 }
0x1a3d   : > { %v2804_v13 = vpop.f32.mrb[63].mxu1  ;;  %v1791_v14 = vsel %vm484_vm4, %v1786_v10, -inf }
0x1a3e   : > { %1792 = vmax.xlane.f32.xlu1 %v1791_v14 }
0x1a4f   : > { %1803 = vrot.lane.b32.xlu1 %v3494_v5, %s3748_s15 }
0x1a53   : > { %1904 = vrot.lane.b32.xlu1 %v3494_v5, %s3749_s16  ;;  %s2534_s16 = sshll.u32 %s3150_s25, 7 }
0x1a54   : > { %s3691_s13 = scalar_lea.hbm %s3739_s6, %s2534_s16 }
0x1acb   : > { %v1793_v15 = vpop.xlane.xlu1 %1792 }
0x1acc   : > { %v1794_v16 = vsub.f32 %v1786_v10, %v1793_v15 }
0x1ace   : > { %v1795_v17 = vmul.f32 1.442695, %v1794_v16 }
0x1acf   : > { %v1804_v25 = vpop.permute.xlu1 %1803 }
0x1ad0   : > { %3000 = vpow2.f32 %v1795_v17  ;;  %v1809_v27 = vsel %vm548_vm6, %v1804_v25, 0  ;;  %v2511_v17 = vld [vmem:[%s3737_s4 + $0x9] ss:$0 sm:$0xff] }
0x1ad3   : > { %v1905_v34 = vpop.permute.xlu1 %1904 }
0x1ad4   : > { %v1910_v35 = vsel %vm484_vm4, %v1905_v34, 0  ;;  %v2961_v34 = vld [vmem:[%s3736_s3 + $0x48] sm:$0xff]  }
0x1ada   : > { %v3001_v19 = vpop.eup %3000 }
0x1adb   : > { %v1797_v20 = vsel %vm484_vm4, %v3001_v19, 0.0 }
0x1adc   : > { %1798 = vadd.xlane.f32.xlu0 %v1797_v20 }
0x1af2   : > { %1693 = vrot.lane.b32.xlu0 %v2501_v21, %s3088_s26 }
0x1af6   : > { %1902 = vrot.lane.b32.xlu0 %v3494_v5, %s3750_s17  ;;  %s242_s17 = scalar_lea.vmem [#allocation2], %s2416_s9 }
0x1b69   : > { %v1799_v22 = vpop.xlane.xlu0 %1798 }
0x1b6a   : > { %3002 = vrcp.f32 %v1799_v22 }
0x1b6d   : > { %v1694_v23 = vpop.permute.xlu0 %1693 }
0x1b6e   : > { %v1699_v24 = vsel %vm548_vm6, %v1694_v23, 0 }
0x1b6f   : > { %2794 = vmatpush3.bf16.msra.mxu0 %v1699_v24 }
0x1b70   : > { %2805 = vmatprep.subr.bf16.mxu0 %v3077_v2 }
0x1b71   : > { %v1903_v36 = vpop.permute.xlu0 %1902 }
0x1b72   : > { %2796 = vmatmul.mubr.msk.bf16.vlgmr.msra.gmra.mrb[28].mxu0 %vm484_vm4, %v1531_v26 }
0x1b73   : > { %2806 = vmatpush3.bf16.msra.mxu0 %v1809_v27  ;;  %2807 = vmatprep.mubr.msk.bf16.mxu0 %vm3078_vm0, %v3077_v2 }
0x1b74   : > { %v3003_v51 = vpop.eup %3002  ;;  %2817 = vmatprep.subr.bf16.mxu0 %v3077_v2 }
0x1b75   : > { %v1801_v31 = vmul.f32 %v3003_v51, %v3001_v19 }
0x1b77   : > { %v1802_v33 = vpack.c.bf16 %v1801_v31, %v1801_v31  ;;  %v2958_v31 = vld [vmem:[%s3735_s2 + $0x24] ss:$8 sps:$4 sm:$0xff]  }
0x1b7a   : > { %2808 = vmatmul.mubr.msk.bf16.vlgmr.msra.gmra.mrb[32].mxu0 %vm484_vm4, %v1802_v33  ;;  %v2960_v33 = vld [vmem:[%s3736_s3 + $0x40] sm:$0xff]  }
0x1b7b   : > { %2819 = vmatprep.mubr.msk.bf16.mxu0 %vm3078_vm0, %v3077_v2 }
0x1b7c   : > { %2818 = vmatpush3.bf16.xpose.msra.mxu0 %v1910_v35  ;;  %v2962_v35 = vld [vmem:[%s3736_s3 + $0x50] sm:$0xff]  }
0x1b7d   : > { %2829 = vmatprep.subr.bf16.mxu0 %v3077_v2 }
0x1b83   : > { %2820 = vmatmul.mubr.msk.bf16.vlgmr.msra.gmra.mrb[36].mxu0 %vm484_vm4, %v1903_v36  ;;  %v2963_v36 = vld [vmem:[%s3736_s3 + $0x58] sm:$0xff]  }
0x1b84   : > { %2831 = vmatprep.mubr.msk.bf16.mxu0 %vm3078_vm0, %v3077_v2 }
0x1c45   : > { %v1735_v37 = vpop.f32.mrb[28].mxu0 }
0x1c46   : > { %v1736_v38 = vadd.f32 %v1735_v37, %v1686_v6  ;;  %v2797_v39 = vpop.f32.mrb[29].mxu0  ;;  %v2964_v37 = vld [vmem:[%s3736_s3 + $0x60] sm:$0xff]  }
0x1c47   : > { %v1738_v29 = vpop.f32.mrb[30].mxu0 }
0x1c48   : > { %v2798_v30 = vpop.f32.mrb[31].mxu0 }
0x1c4d   : > { %v1845_v40 = vpop.f32.mrb[32].mxu0 }
0x1c4e   : > { %v2809_v41 = vpop.f32.mrb[33].mxu0  ;;  %v1851_v63 = vpack.c.bf16 %v1845_v40, %v1845_v40 }
0x1c4f   : > { %v1848_v42 = vpop.f32.mrb[34].mxu0  ;;  %v2512_v41 = vld [vmem:[%s3737_s4 + $0xa] ss:$0 sm:$0xff] }
0x1c50   : > { %v2810_v43 = vpop.f32.mrb[35].mxu0 }
0x1c51   : > { %v2513_v43 = vld [vmem:[%s3737_s4 + $0xb] ss:$0 sm:$0xff] }
0x1c56   : > { %v1946_v46 = vpop.f32.mrb[36].mxu0 }
0x1c57   : > { %v1947_v47 = vadd.f32 %v1946_v46, %v3280_v53  ;;  %v2821_v45 = vpop.f32.mrb[37].mxu0  ;;  %v2505_v53 = vcombine.low %v3474_v55, %v3474_v55 }
0x1c58   : > { %v1949_v32 = vpop.f32.mrb[38].mxu0 }
0x1c59   : > { %v2822_v48 = vpop.f32.mrb[39].mxu0  ;;  %v1952_v49 = vsel %vm484_vm4, %v1947_v47, -inf  ;;  %v2966_v32 = vld [vmem:[%s3736_s3 + $0x70] sm:$0xff]  }
0x1c5a   : > { %1953 = vmax.xlane.f32.xlu1 %v1952_v49  ;;  %v2967_v48 = vld [vmem:[%s3736_s3 + $0x78] sm:$0xff]   ;;  %v2514_v49 = vld [vmem:[%s3737_s4 + $0xd] ss:$0 sm:$0xff] }
0x1c6b   : > { %1964 = vrot.lane.b32.xlu1 %v3494_v5, %s3751_s18  ;;  %s2353_s18 = sshll.u32 %s242_s17, 4  ;;  %s3693_s18 = int_to_ptr.vmem [resolvable:$true] %s2353_s18 }
0x1c6c   : > { %s3012_s25 = scalar_lea.vmem %s3693_s18, 128  ;;  %p3019_p0 = scmp.lt.s32.totalorder %s3693_s18, %s3017_s12 }
0x1c6d   : > { %p3013_p11 = scmp.ne.s32.totalorder %s3693_s18, %s3012_s25  ;;  %p3020_p1 = scmp.lt.s32.totalorder %s3018_s28, %s3012_s25 }
0x1c6f   : > { %2014 = vrot.lane.b32.xlu1 %v2509_v59, %s3088_s26  ;;  %p3014_p12 = pnand %p3013_p11, %p3167_p5  ;;  %p3021_p2 = por %p3020_p1, %p3019_p0 }
0x1c71   : > { %p3015_p13 = pneg %p3014_p12 }
0x1c73   : > { %p3022_p3 = pnand %p3021_p2, %p3015_p13 }
0x1ce7   : > { %v1954_v50 = vpop.xlane.xlu1 %1953 }
0x1ce8   : > { %v1955_v52 = vsub.f32 %v1947_v47, %v1954_v50 }
0x1cea   : > { %v1956_v54 = vmul.f32 1.442695, %v1955_v52 }
0x1ceb   : > { %v1965_v62 = vpop.permute.xlu1 %1964 }
0x1cec   : > { %3004 = vpow2.f32 %v1956_v54  ;;  %v1970_v0 = vsel %vm548_vm6, %v1965_v62, 0 }
0x1cef   : > { %v2015_v28 = vpop.permute.xlu1 %2014 }
0x1cf0   : > { %v2020_v3 = vsel %vm548_vm6, %v2015_v28, 0 }
0x1cf1   : > { %2830 = vmatpush3.bf16.msra.mxu0 %v2020_v3 }
0x1cf2   : > { %2843 = vmatprep.subr.bf16.mxu0 %v3077_v2 }
0x1cf6   : > { %v3005_v57 = vpop.eup %3004 }
0x1cf7   : > { %v1958_v58 = vsel %vm484_vm4, %v3005_v57, 0.0 }
0x1cf8   : > { %1959 = vadd.xlane.f32.xlu0 %v1958_v58 }
0x1d0e   : > { %1853 = vrot.lane.b32.xlu0 %v2505_v53, %s3088_s26 }
0x1d85   : > { %v1960_v60 = vpop.xlane.xlu0 %1959 }
0x1d86   : > { %3006 = vrcp.f32 %v1960_v60 }
0x1d89   : > { %v1854_v5 = vpop.permute.xlu0 %1853 }
0x1d8a   : > { %v1859_v61 = vsel %vm548_vm6, %v1854_v5, 0  ;;  %v2526_v5 = vld [vmem:[%s3737_s4 + $0xc] ss:$0 sm:$0xff] }
0x1d8b   : > { %2812 = vmatpush3.bf16.msra.mxu1 %v1859_v61 }
0x1d8c   : > { %2823 = vmatprep.subr.bf16.mxu1 %v3077_v2 }
0x1d8e   : > { %2814 = vmatmul.mubr.msk.bf16.vlgmr.msra.gmra.mrb[64].mxu1 %vm484_vm4, %v1851_v63 }
0x1d8f   : > { %2824 = vmatpush3.bf16.msra.mxu1 %v1970_v0  ;;  %2825 = vmatprep.mubr.msk.bf16.mxu1 %vm3078_vm0, %v3077_v2 }
0x1d90   : > { %v3007_v55 = vpop.eup %3006  ;;  %2835 = vmatprep.subr.bf16.mxu1 %v3077_v2 }
0x1d91   : > { %v1962_v56 = vmul.f32 %v3007_v55, %v3005_v57 }
0x1d93   : > { %v1963_v1 = vpack.c.bf16 %v1962_v56, %v1962_v56 }
0x1d96   : > { %2826 = vmatmul.mubr.msk.bf16.vlgmr.msra.gmra.mrb[68].mxu1 %vm484_vm4, %v1963_v1 }
0x1d97   : > { %2839 = vmatprep.mubr.msk.bf16.mxu1 %vm3078_vm0, %v3077_v2  ;;  %2836 = vmatpush3.bf16.msra.mxu1 %v2958_v31 }
0x1d98   : > { %2837 = vmatprep.subr.bf16.mxu1 %v3077_v2 }
0x1e61   : > { %v1895_v4 = vpop.f32.mrb[64].mxu1 }
0x1e62   : > { %v1901_v6 = vadd.f32 %v1895_v4, %v1736_v38  ;;  %v2815_v7 = vpop.f32.mrb[65].mxu1  ;;  %v2965_v38 = vld [vmem:[%s3736_s3 + $0x68] sm:$0xff]  }
0x1e63   : > { %v1898_v8 = vpop.f32.mrb[66].mxu1  ;;  %v2968_v7 = vld [vmem:[%s3738_s5] sm:$0xff]  }
0x1e64   : > { %v2816_v9 = vpop.f32.mrb[67].mxu1  ;;  %v2969_v8 = vld [vmem:[%s3738_s5 + $0x8] sm:$0xff]  }
0x1e69   : > { %v2006_v18 = vpop.f32.mrb[68].mxu1 }
0x1e6a   : > { %v2012_v10 = vpack.c.bf16 %v2006_v18, %v2006_v18  ;;  %v2827_v11 = vpop.f32.mrb[69].mxu1 }
0x1e6b   : > { %v2009_v12 = vpop.f32.mrb[70].mxu1 }
0x1e6c   : > { %v2828_v13 = vpop.f32.mrb[71].mxu1  ;;  %2832 = vmatmul.mubr.msk.bf16.vlgmr.msra.gmra.mrb[40].mxu0 %vm484_vm4, %v2012_v10  ;;  %v2527_v12 = vld [vmem:[%s3737_s4 + $0xe] ss:$0 sm:$0xff] }
0x1e6d   : > { %2859 = vmatprep.mubr.msk.bf16.mxu0 %vm3078_vm0, %v3077_v2  ;;  %2844 = vmatpush3.bf16.msra.mxu0 %v2960_v33 }
0x1e6e   : > { %2845 = vmatprep.subr.bf16.mxu0 %v3077_v2 }
0x1e71   : > { %2846 = vmatpush3.bf16.msra.mxu0 %v2961_v34 }
0x1e72   : > { %2847 = vmatprep.subr.bf16.mxu0 %v3077_v2 }
0x1e75   : > { %2848 = vmatpush3.bf16.msra.mxu0 %v2962_v35 }
0x1e76   : > { %2849 = vmatprep.subr.bf16.mxu0 %v3077_v2 }
0x1e79   : > { %2850 = vmatpush3.bf16.msra.mxu0 %v2963_v36 }
0x1e7a   : > { %2851 = vmatprep.subr.bf16.mxu0 %v3077_v2 }
0x1e7d   : > { %2852 = vmatpush3.bf16.msra.mxu0 %v2964_v37 }
0x1e7e   : > { %2853 = vmatprep.subr.bf16.mxu0 %v3077_v2 }
0x1e81   : > { %2854 = vmatpush3.bf16.msra.mxu0 %v2965_v38 }
0x1e82   : > { %2855 = vmatprep.subr.bf16.mxu0 %v3077_v2 }
0x1e85   : > { %2856 = vmatpush3.bf16.msra.mxu0 %v2966_v32 }
0x1e86   : > { %2857 = vmatprep.subr.bf16.mxu0 %v3077_v2 }
0x1e89   : > { %2858 = vmatpush3.bf16.msra.mxu0 %v2967_v48 }
0x1f3f   : > { %v2056_v14 = vpop.f32.mrb[40].mxu0 }
0x1f40   : > { %v2062_v15 = vadd.f32 %v2056_v14, %v1901_v6  ;;  %v2833_v16 = vpop.f32.mrb[41].mxu0  ;;  %v2528_v14 = vld [vmem:[%s3737_s4 + $0xf] ss:$0 sm:$0xff] }
0x1f41   : > { %v2059_v19 = vpop.f32.mrb[42].mxu0 }
0x1f42   : > { %v2063_v20 = vadd.f32 %v2062_v15, %v3453_v44  ;;  %v2834_v21 = vpop.f32.mrb[43].mxu0  ;;  %v2959_v44 = vld [vmem:[%s3735_s2 + $0x34] ss:$8 sps:$4 sm:$0xff]  }
0x1f43   : > { %2838 = vmatpush3.bf16.msra.mxu1 %v2959_v44 }
0x1f44   : > { %v2068_v22 = vadd.f32 %v2511_v17, %v2063_v20  ;;  %2863 = vmatprep.subr.bf16.mxu1 %v3077_v2 }
0x1f46   : > { %v2069_v23 = vsel %vm399_vm3, %v2068_v22, 0.0 }
0x1f47   : > { %2070 = vadd.xlane.f32.xlu0 %v2069_v23 }
0x1fd4   : > { %v2071_v24 = vpop.xlane.xlu0 %2070 }
0x1fd5   : > { %v2072_v25 = vmul.f32 0.03125, %v2071_v24 }
0x1fd7   : > { %v2073_v26 = vsub.f32 %v2068_v22, %v2072_v25 }
0x1fd9   : > { %v2074_v27 = vmul.f32 %v2073_v26, %v2073_v26 }
0x1fdb   : > { %v2075_v51 = vsel %vm399_vm3, %v2074_v27, 0.0 }
0x1fdc   : > { %2076 = vadd.xlane.f32.xlu1 %v2075_v51 }
0x2069   : > { %v2077_v39 = vpop.xlane.xlu1 %2076 }
0x206a   : > { %v2078_v29 = vmul.f32 0.03125, %v2077_v39 }
0x206c   : > { %v2079_v30 = vadd.f32 1e-05, %v2078_v29 }
0x206e   : > { %3008 = vrsqrt.f32 %v2079_v30 }
0x2078   : > { %v3009_v40 = vpop.eup %3008 }
0x2079   : > { %v2081_v42 = vmul.f32 %v3009_v40, %v2073_v26 }
0x207b   : > { %v2086_v46 = vmul.f32 %v2512_v41, %v2081_v42 }
0x207d   : > { %v2091_v47 = vadd.f32 %v2513_v43, %v2086_v46 }
0x207f   : > { %v2092_v45 = vpack.c.bf16 %v2091_v47, %v2091_v47 }
0x2081   : > { %2840 = vmatmul.mubr.msk.bf16.vlgmr.msra.gmra.mrb[72].mxu1 %vm399_vm3, %v2092_v45 }
0x2082   : > { %2867 = vmatprep.mubr.msk.bf16.mxu1 %vm3078_vm0, %v3077_v2  ;;  %2864 = vmatpush3.bf16.msra.mxu1 %v2968_v7 }
0x2083   : > { %2865 = vmatprep.subr.bf16.mxu1 %v3077_v2  ;;  %v2529_v2 = vld [vmem:[%s3737_s4 + $0x10] ss:$0 sm:$0xff] }
0x2086   : > { %2866 = vmatpush3.bf16.msra.mxu1 %v2969_v8 }
0x2154   : > { %v2146_v50 = vpop.f32.mrb[72].mxu1 }
0x2155   : > { %v2147_v52 = vadd.f32 %v2514_v49, %v2146_v50  ;;  %v2841_v54 = vpop.f32.mrb[73].mxu1 }
0x2156   : > { %v2149_v57 = vpop.f32.mrb[74].mxu1 }
0x2157   : > { %v2152_v58 = vmax.f32 %v2147_v52, 0.0  ;;  %v2842_v53 = vpop.f32.mrb[75].mxu1 }
0x2159   : > { %v2153_v59 = vpack.c.bf16 %v2152_v58, %v2152_v58 }
0x215b   : > { %2860 = vmatmul.mubr.bf16.vlgmr.msra.gmra.mrb[44].mxu0 %v2153_v59 }
0x222e   : > { %v2236_v60 = vpop.f32.mrb[44].mxu0 }
0x222f   : > { %v2242_v61 = vadd.f32 %v2236_v60, %v2068_v22  ;;  %v2861_v62 = vpop.f32.mrb[45].mxu0 }
0x2230   : > { %v2239_v63 = vpop.f32.mrb[46].mxu0 }
0x2231   : > { %v2862_v0 = vpop.f32.mrb[47].mxu0  ;;  %v2247_v55 = vadd.f32 %v2526_v5, %v2242_v61 }
0x2233   : > { %v2251_v56 = vsel %vm399_vm3, %v2247_v55, 0.0 }
0x2234   : > { %2252 = vadd.xlane.f32.xlu0 %v2251_v56 }
0x22c1   : > { %v2253_v1 = vpop.xlane.xlu0 %2252 }
0x22c2   : > { %v2254_v28 = vmul.f32 0.03125, %v2253_v1 }
0x22c4   : > { %v2255_v3 = vsub.f32 %v2247_v55, %v2254_v28 }
0x22c6   : > { %v2256_v4 = vmul.f32 %v2255_v3, %v2255_v3 }
0x22c8   : > { %v2257_v6 = vsel %vm399_vm3, %v2256_v4, 0.0 }
0x22c9   : > { %2258 = vadd.xlane.f32.xlu0 %v2257_v6 }
0x2356   : > { %v2259_v9 = vpop.xlane.xlu0 %2258 }
0x2357   : > { %v2260_v18 = vmul.f32 0.03125, %v2259_v9 }
0x2359   : > { %v2261_v10 = vadd.f32 1e-05, %v2260_v18 }
0x235b   : > { %3010 = vrsqrt.f32 %v2261_v10 }
0x2365   : > { %v3011_v11 = vpop.eup %3010 }
0x2366   : > { %v2263_v13 = vmul.f32 %v3011_v11, %v2255_v3 }
0x2368   : > { %v2268_v15 = vmul.f32 %v2527_v12, %v2263_v13 }
0x236a   : > { %v2273_v16 = vadd.f32 %v2528_v14, %v2268_v15 }
0x236c   : > { %v2274_v17 = vpack.c.bf16 %v2273_v16, %v2273_v16 }
0x236e   : > { %2868 = vmatmul.mubr.msk.bf16.vlgmr.msra.gmra.mrb[76].mxu1 %vm399_vm3, %v2274_v17 }
0x2441   : > { %v2332_v19 = vpop.f32.mrb[76].mxu1 }
0x2442   : > { %v2333_v20 = vadd.f32 %v2529_v2, %v2332_v19  ;;  %v2869_v21 = vpop.f32.mrb[77].mxu1 }
0x2443   : > { %v2335_v22 = vpop.f32.mrb[78].mxu1 }
0x2444   : > { %2338 = vst [vmem:[%s242_s17] sm:$0xff] %v2333_v20  ;;  %v2870_v23 = vpop.f32.mrb[79].mxu1 }
0x2445   : > { %3025 = shalt.err (!%p3022_p3)
}
0x2446   : > { %s3026_s20 = scalar_lea.hbm %s3691_s13, 128  ;;  %s3030_s14 = scalar_lea.hbm %s3739_s6, 256 }
0x2447   : > { %p3027_p4 = scmp.ne.s32.totalorder %s3691_s13, %s3026_s20  ;;  %p3031_p9 = scmp.lt.u32.totalorder %s3691_s13, %s3739_s6 }
0x2448   : > { %p3032_p10 = scmp.lt.u32.totalorder %s3030_s14, %s3026_s20  ;;  %p3034_p12 = scmp.lt.u32.totalorder %s3026_s20, %s3691_s13 }
0x2449   : > { %p3028_p7 = pnand %p3027_p4, %p3167_p5 }
0x244a   : > { %p3033_p11 = por %p3032_p10, %p3031_p9 }
0x244b   : > { %p3029_p8 = pneg %p3028_p7 }
0x244c   : > { %p3035_p13 = por %p3034_p12, %p3033_p11 }
0x244e   : > { %p3036_p0 = pnand %p3035_p13, %p3029_p8 }
0x2450   : > { %3039 = shalt.err (!%p3036_p0)
}
0x2451   : > { %2871 = dma.vmem_to_hbm [thread:$0]  (%p3167_p5), %s3693_s18, 128, %s3691_s13, %s2340_s10  }
0x2452 PF: > { %p2877_p1 = scmp.ge.s32.totalorder %s3074_s24, 2  ;;  %s2365_s17 = sand.u32 1, %s3062_s21  }
0x2453   : > { %s2366_s19 = scalar_lea.sflag [#allocation3], %s2365_s17 }
0x2454   : > { %p2874_p2 = pnand %p2877_p1, %p3171_p6 }
0x2456   : > { %3057 = dma.done.wait (!%p2874_p2), %s2366_s19, 128  }
0x2457   : > { %3059 = vsyncadd (!%p2874_p2), %s2366_s19, 4294967168  ;;  %p16_p3 = scmp.ge.s32.totalorder %s3154_s27, 4   ;;  %s3752_s21 = smov %s3066_s22 }
0x2458   : > { %s3753_s22 = smov %s3070_s23  ;;  %s3754_s23 = smov %s3165_s30 }
0x2459   : > { %s3755_s24 = smov %s3154_s27  ;;  %18 = sbr.rel (!%p16_p3) target bundleno = 3 (0x3), region = 81 }
0x2460   :  { %2371 = vsyncpa [#allocation3], 1 }
0x2461   :  { %2373 = vsyncpa [#allocation3 + $0x1], 1 }

</bundles_post_ra>
